<compile_context>
chip_gen: v7x
topology: tpu7x:2x2x1
jax: 0.10.0
libtpu: 0.0.40
codegen_flags: <defaults>
</compile_context>

<pallas_src>
import jax
import jax.numpy as jnp
from jax.experimental import pallas as pl
from jax.experimental.pallas import tpu as pltpu


def _erf_approx(v):
    # Abramowitz & Stegun 7.1.26 (max abs err ~1.5e-7); only exp / mul / add /
    # where / abs / reciprocal, all of which lower cleanly in Mosaic.
    a1, a2, a3, a4, a5 = 0.254829592, -0.284496736, 1.421413741, -1.453152027, 1.061405429
    p = 0.3275911
    s = jnp.where(v >= 0.0, 1.0, -1.0)
    a = jnp.abs(v)
    # approx=True (EUP vrcp) was evaluated but rejected: its relative error,
    # amplified through three GELU stages + the multiplicative gate, risks the
    # 1e-4 tolerance against exact-erf GELU.  Keep the exact reciprocal.
    t = pl.reciprocal(1.0 + p * a, approx=False)
    poly = ((((a5 * t + a4) * t + a3) * t + a2) * t + a1) * t
    return s * (1.0 - poly * jnp.exp(-a * a))


def _gelu(v):
    # exact (erf-based) GELU, matching torch.nn.functional.gelu default
    return 0.5 * v * (1.0 + _erf_approx(v * 0.7071067811865476))


def make_lka_kernel(H, W):
    L = H * W
    pow2_w = (W & (W - 1)) == 0

    def kernel(x_ref, dw1_ref, pw1_ref, s1_ref, b1_ref,
               dw2_ref, pw2_ref, s2_ref, b2_ref, wc_ref, o_ref):
        x = x_ref[0].astype(jnp.float32)                       # (C, H*W), lane-dense
        C = x.shape[0]

        # flattened position / column-in-row indices, hoisted once per image
        pos = jax.lax.broadcasted_iota(jnp.int32, (C, L), 1)
        col = (pos & (W - 1)) if pow2_w else (pos % W)

        def shifted_tap(v, dy, dx):
            # v[:, i] -> v[:, i + dy*W + dx], zeroed where (row+dy, col+dx)
            # leaves the image.  Roll runs on the XLU slot; masks are cheap
            # VPU compares.  Row validity reduces to a comparison on pos.
            d = dy * W + dx
            t = v if d == 0 else pltpu.roll(v, shift=(-d) % L, axis=1)
            m = None

            def conj(cur, cond):
                return cond if cur is None else jnp.logical_and(cur, cond)

            if dy > 0:
                m = conj(m, pos < (H - dy) * W)
            elif dy < 0:
                m = conj(m, pos >= (-dy) * W)
            if dx > 0:
                m = conj(m, col < (W - dx))
            elif dx < 0:
                m = conj(m, col >= (-dx))
            return t if m is None else jnp.where(m, t, 0.0)

        def depthwise3x3(v, dw, dil):
            # dw: (C, 9) with tap index k = (ky+1)*3 + (kx+1)
            acc = jnp.zeros_like(v)
            k = 0
            for ky in (-1, 0, 1):
                for kx in (-1, 0, 1):
                    acc = acc + shifted_tap(v, ky * dil, kx * dil) * dw[:, k:k + 1]
                    k += 1
            return acc

        def pointwise(v, w):
            # 1x1 conv as a C-term VPU multiply-add: y[f, :] = sum_c w[f, c] * v[c, :]
            y = w[:, 0:1] * v[0:1, :]
            for c in range(1, v.shape[0]):
                y = y + w[:, c:c + 1] * v[c:c + 1, :]
            return y

        # ---- stage 1: depthwise 3x3 (dil=1) -> pointwise 1x1 -> BN -> GELU ----
        x1 = _gelu(pointwise(depthwise3x3(x, dw1_ref[...], 1), pw1_ref[...])
                   * s1_ref[...] + b1_ref[...])
        # ---- stage 2: depthwise 3x3 (dil=3) -> pointwise 1x1 -> BN -> GELU ----
        x2 = _gelu(pointwise(depthwise3x3(x1, dw2_ref[...], 3), pw2_ref[...])
                   * s2_ref[...] + b2_ref[...])
        # ---- stage 3: 1x1 conv -> ReLU -> GELU, then gate with the input ----
        x3 = _gelu(jnp.maximum(pointwise(x2, wc_ref[...]), 0.0))
        o_ref[0] = (x3 * x).astype(o_ref.dtype)

    return kernel


def lka_forward(x_nchw, params):
    N, C, H, W = x_nchw.shape
    F = params["wc"].shape[0]
    if F != C:
        raise ValueError("LKA gate x3 * x requires fltr == in_channels")
    L = H * W
    x = x_nchw.astype(jnp.float32).reshape(N, C, L)     # free reshape, no transpose
    col = lambda p: jnp.asarray(p, jnp.float32).reshape(-1, 1)
    full = lambda r, c: pl.BlockSpec((r, c), lambda b: (0, 0))

    out = pl.pallas_call(
        make_lka_kernel(H, W),
        out_shape=jax.ShapeDtypeStruct((N, F, L), jnp.float32),
        grid=(N,),
        in_specs=[
            pl.BlockSpec((1, C, L), lambda b: (b, 0, 0)),
            full(C, 9), full(C, C), full(C, 1), full(C, 1),
            full(C, 9), full(C, C), full(C, 1), full(C, 1),
            full(F, C),
        ],
        out_specs=pl.BlockSpec((1, F, L), lambda b: (b, 0, 0)),
        compiler_params=pltpu.CompilerParams(dimension_semantics=("parallel",)),
    )(x, params["dw1"], params["pw1"], col(params["s1"]), col(params["b1"]),
      params["dw2"], params["pw2"], col(params["s2"]), col(params["b2"]),
      params["wc"])
    return out.reshape(N, F, H, W)


def init_params(key, C, F):
    ks = jax.random.split(key, 13)
    nrm = lambda k, shape, s=0.2: s * jax.random.normal(k, shape, jnp.float32)
    eps = 1e-5

    def bn(kg, kb, km, kv):
        gamma = 1.0 + nrm(kg, (C,), 0.1)
        beta = nrm(kb, (C,), 0.1)
        mean = nrm(km, (C,), 0.1)
        var = 1.0 + jnp.abs(nrm(kv, (C,), 0.1))
        scale = gamma / jnp.sqrt(var + eps)
        shift = beta - mean * scale
        return scale, shift

    s1, b1 = bn(ks[2], ks[3], ks[4], ks[5])
    s2, b2 = bn(ks[8], ks[9], ks[10], ks[11])
    return {
        "dw1": nrm(ks[0], (C, 9)),     # depthwise taps, [c, ky*3 + kx]
        "pw1": nrm(ks[1], (C, C)),     # pointwise 1x1, (out, in)
        "s1": s1, "b1": b1,            # folded BN (inference)
        "dw2": nrm(ks[6], (C, 9)),
        "pw2": nrm(ks[7], (C, C)),
        "s2": s2, "b2": b2,
        "wc": nrm(ks[12], (F, C)),     # final 1x1 conv, (out, in)
    }


def lka_reference(x, params):
    # Pure-JAX NCHW reference (exact erf GELU) for correctness checking.
    C = x.shape[1]
    hp = jax.lax.Precision.HIGHEST

    def dw(v, w_c9, dil):
        w = w_c9.reshape(C, 1, 3, 3)                 # OIHW, grouped
        return jax.lax.conv_general_dilated(
            v, w, window_strides=(1, 1), padding=[(dil, dil), (dil, dil)],
            rhs_dilation=(dil, dil),
            dimension_numbers=("NCHW", "OIHW", "NCHW"),
            feature_group_count=C, precision=hp)

    gelu = lambda v: jax.nn.gelu(v, approximate=False)
    bc = lambda p: p.reshape(1, -1, 1, 1)
    y1 = jnp.einsum("nchw,dc->ndhw", dw(x, params["dw1"], 1), params["pw1"], precision=hp)
    x1 = gelu(y1 * bc(params["s1"]) + bc(params["b1"]))
    y2 = jnp.einsum("nchw,dc->ndhw", dw(x1, params["dw2"], 3), params["pw2"], precision=hp)
    x2 = gelu(y2 * bc(params["s2"]) + bc(params["b2"]))
    y3 = jnp.einsum("nchw,fc->nfhw", x2, params["wc"], precision=hp)
    x3 = gelu(jnp.maximum(y3, 0.0))
    return x3 * x


if __name__ == "__main__":
    key = jax.random.PRNGKey(0)
    kx, kp = jax.random.split(key)
    N, C, H, W = 2, 4, 16, 16
    F = C  # fltr == in_channels so the final elementwise gate (x3 * x) is well-defined
    x = jax.random.normal(kx, (N, C, H, W), jnp.float32)
    params = init_params(kp, C, F)

    out = jax.block_until_ready(lka_forward(x, params))
    ref = lka_reference(x, params)

    assert out.shape == (N, F, H, W)
    err = float(jnp.max(jnp.abs(out - ref)))
    assert jnp.allclose(out, ref, atol=1e-4, rtol=1e-4), err
    print("KERNEL_OK")
</pallas_src>

<mosaic_0001>
module attributes {stable_mosaic.version = 11 : i64} {
  func.func @kernel(%arg0: i32, %arg1: memref<1x4x256xf32, #tpu.memory_space<vmem>>, %arg2: memref<4x9xf32, #tpu.memory_space<vmem>>, %arg3: memref<4x4xf32, #tpu.memory_space<vmem>>, %arg4: memref<4x1xf32, #tpu.memory_space<vmem>>, %arg5: memref<4x1xf32, #tpu.memory_space<vmem>>, %arg6: memref<4x9xf32, #tpu.memory_space<vmem>>, %arg7: memref<4x4xf32, #tpu.memory_space<vmem>>, %arg8: memref<4x1xf32, #tpu.memory_space<vmem>>, %arg9: memref<4x1xf32, #tpu.memory_space<vmem>>, %arg10: memref<4x4xf32, #tpu.memory_space<vmem>>, %arg11: memref<1x4x256xf32, #tpu.memory_space<vmem>>) attributes {dimension_semantics = [#tpu.dimension_semantics<parallel>], iteration_bounds = array<i64: 2>, scalar_prefetch = 0 : i64, scratch_operands = 0 : i64, tpu.core_type = #tpu.core_type<tc>, window_params = [{transform_indices = @transform_0, window_bounds = array<i64: 1, 4, 256>}, {pipeline_mode = #tpu.pipeline_mode<synchronous>, transform_indices = @transform_1, window_bounds = array<i64: 4, 9>}, {pipeline_mode = #tpu.pipeline_mode<synchronous>, transform_indices = @transform_2, window_bounds = array<i64: 4, 4>}, {pipeline_mode = #tpu.pipeline_mode<synchronous>, transform_indices = @transform_3, window_bounds = array<i64: 4, 1>}, {pipeline_mode = #tpu.pipeline_mode<synchronous>, transform_indices = @transform_4, window_bounds = array<i64: 4, 1>}, {pipeline_mode = #tpu.pipeline_mode<synchronous>, transform_indices = @transform_5, window_bounds = array<i64: 4, 9>}, {pipeline_mode = #tpu.pipeline_mode<synchronous>, transform_indices = @transform_6, window_bounds = array<i64: 4, 4>}, {pipeline_mode = #tpu.pipeline_mode<synchronous>, transform_indices = @transform_7, window_bounds = array<i64: 4, 1>}, {pipeline_mode = #tpu.pipeline_mode<synchronous>, transform_indices = @transform_8, window_bounds = array<i64: 4, 1>}, {pipeline_mode = #tpu.pipeline_mode<synchronous>, transform_indices = @transform_9, window_bounds = array<i64: 4, 4>}, {transform_indices = @transform_10, window_bounds = array<i64: 1, 4, 256>}]} {
    %c0 = arith.constant 0 : index
    %c0_0 = arith.constant 0 : index
    %c0_1 = arith.constant 0 : index
    %0 = vector.load %arg1[%c0, %c0_0, %c0_1] : memref<1x4x256xf32, #tpu.memory_space<vmem>>, vector<1x4x256xf32>
    %1 = vector.shape_cast %0 : vector<1x4x256xf32> to vector<4x256xf32>
    %2 = tpu.iota {dimensions = array<i32: 1>} : vector<4x256xi32>
    %c15_i32 = arith.constant 15 : i32
    %3 = vector.broadcast %c15_i32 : i32 to vector<4x256xi32>
    %4 = arith.andi %2, %3 : vector<4x256xi32>
    %c0_2 = arith.constant 0 : index
    %c0_3 = arith.constant 0 : index
    %5 = vector.load %arg2[%c0_2, %c0_3] : memref<4x9xf32, #tpu.memory_space<vmem>>, vector<4x9xf32>
    %cst = arith.constant 0.000000e+00 : f32
    %6 = vector.broadcast %cst : f32 to vector<4x256xf32>
    %c17_i32 = arith.constant 17 : i32
    %7 = tpu.dynamic_rotate %1 by %c17_i32 dim 1 : vector<4x256xf32>, i32 -> vector<4x256xf32>
    %c16_i32 = arith.constant 16 : i32
    %8 = vector.broadcast %c16_i32 : i32 to vector<4x256xi32>
    %9 = arith.cmpi sge, %2, %8 : vector<4x256xi32>
    %c1_i32 = arith.constant 1 : i32
    %10 = vector.broadcast %c1_i32 : i32 to vector<4x256xi32>
    %11 = arith.cmpi sge, %4, %10 : vector<4x256xi32>
    %12 = arith.andi %9, %11 : vector<4x256xi1>
    %cst_4 = arith.constant 0.000000e+00 : f32
    %13 = vector.broadcast %cst_4 : f32 to vector<4x256xf32>
    %14 = arith.select %12, %7, %13 : vector<4x256xi1>, vector<4x256xf32>
    %15 = vector.extract_strided_slice %5 {offsets = [0, 0], sizes = [4, 1], strides = [1, 1]} : vector<4x9xf32> to vector<4x1xf32>
    %16 = vector.broadcast %15 : vector<4x1xf32> to vector<4x256xf32>
    %17 = arith.mulf %14, %16 : vector<4x256xf32>
    %18 = arith.addf %6, %17 : vector<4x256xf32>
    %c16_i32_5 = arith.constant 16 : i32
    %19 = tpu.dynamic_rotate %1 by %c16_i32_5 dim 1 : vector<4x256xf32>, i32 -> vector<4x256xf32>
    %c16_i32_6 = arith.constant 16 : i32
    %20 = vector.broadcast %c16_i32_6 : i32 to vector<4x256xi32>
    %21 = arith.cmpi sge, %2, %20 : vector<4x256xi32>
    %cst_7 = arith.constant 0.000000e+00 : f32
    %22 = vector.broadcast %cst_7 : f32 to vector<4x256xf32>
    %23 = arith.select %21, %19, %22 : vector<4x256xi1>, vector<4x256xf32>
    %24 = vector.extract_strided_slice %5 {offsets = [0, 1], sizes = [4, 1], strides = [1, 1]} : vector<4x9xf32> to vector<4x1xf32>
    %25 = vector.broadcast %24 : vector<4x1xf32> to vector<4x256xf32>
    %26 = arith.mulf %23, %25 : vector<4x256xf32>
    %27 = arith.addf %18, %26 : vector<4x256xf32>
    %c15_i32_8 = arith.constant 15 : i32
    %28 = tpu.dynamic_rotate %1 by %c15_i32_8 dim 1 : vector<4x256xf32>, i32 -> vector<4x256xf32>
    %c16_i32_9 = arith.constant 16 : i32
    %29 = vector.broadcast %c16_i32_9 : i32 to vector<4x256xi32>
    %30 = arith.cmpi sge, %2, %29 : vector<4x256xi32>
    %c15_i32_10 = arith.constant 15 : i32
    %31 = vector.broadcast %c15_i32_10 : i32 to vector<4x256xi32>
    %32 = arith.cmpi slt, %4, %31 : vector<4x256xi32>
    %33 = arith.andi %30, %32 : vector<4x256xi1>
    %cst_11 = arith.constant 0.000000e+00 : f32
    %34 = vector.broadcast %cst_11 : f32 to vector<4x256xf32>
    %35 = arith.select %33, %28, %34 : vector<4x256xi1>, vector<4x256xf32>
    %36 = vector.extract_strided_slice %5 {offsets = [0, 2], sizes = [4, 1], strides = [1, 1]} : vector<4x9xf32> to vector<4x1xf32>
    %37 = vector.broadcast %36 : vector<4x1xf32> to vector<4x256xf32>
    %38 = arith.mulf %35, %37 : vector<4x256xf32>
    %39 = arith.addf %27, %38 : vector<4x256xf32>
    %c1_i32_12 = arith.constant 1 : i32
    %40 = tpu.dynamic_rotate %1 by %c1_i32_12 dim 1 : vector<4x256xf32>, i32 -> vector<4x256xf32>
    %c1_i32_13 = arith.constant 1 : i32
    %41 = vector.broadcast %c1_i32_13 : i32 to vector<4x256xi32>
    %42 = arith.cmpi sge, %4, %41 : vector<4x256xi32>
    %cst_14 = arith.constant 0.000000e+00 : f32
    %43 = vector.broadcast %cst_14 : f32 to vector<4x256xf32>
    %44 = arith.select %42, %40, %43 : vector<4x256xi1>, vector<4x256xf32>
    %45 = vector.extract_strided_slice %5 {offsets = [0, 3], sizes = [4, 1], strides = [1, 1]} : vector<4x9xf32> to vector<4x1xf32>
    %46 = vector.broadcast %45 : vector<4x1xf32> to vector<4x256xf32>
    %47 = arith.mulf %44, %46 : vector<4x256xf32>
    %48 = arith.addf %39, %47 : vector<4x256xf32>
    %49 = vector.extract_strided_slice %5 {offsets = [0, 4], sizes = [4, 1], strides = [1, 1]} : vector<4x9xf32> to vector<4x1xf32>
    %50 = vector.broadcast %49 : vector<4x1xf32> to vector<4x256xf32>
    %51 = arith.mulf %1, %50 : vector<4x256xf32>
    %52 = arith.addf %48, %51 : vector<4x256xf32>
    %c255_i32 = arith.constant 255 : i32
    %53 = tpu.dynamic_rotate %1 by %c255_i32 dim 1 : vector<4x256xf32>, i32 -> vector<4x256xf32>
    %c15_i32_15 = arith.constant 15 : i32
    %54 = vector.broadcast %c15_i32_15 : i32 to vector<4x256xi32>
    %55 = arith.cmpi slt, %4, %54 : vector<4x256xi32>
    %cst_16 = arith.constant 0.000000e+00 : f32
    %56 = vector.broadcast %cst_16 : f32 to vector<4x256xf32>
    %57 = arith.select %55, %53, %56 : vector<4x256xi1>, vector<4x256xf32>
    %58 = vector.extract_strided_slice %5 {offsets = [0, 5], sizes = [4, 1], strides = [1, 1]} : vector<4x9xf32> to vector<4x1xf32>
    %59 = vector.broadcast %58 : vector<4x1xf32> to vector<4x256xf32>
    %60 = arith.mulf %57, %59 : vector<4x256xf32>
    %61 = arith.addf %52, %60 : vector<4x256xf32>
    %c241_i32 = arith.constant 241 : i32
    %62 = tpu.dynamic_rotate %1 by %c241_i32 dim 1 : vector<4x256xf32>, i32 -> vector<4x256xf32>
    %c240_i32 = arith.constant 240 : i32
    %63 = vector.broadcast %c240_i32 : i32 to vector<4x256xi32>
    %64 = arith.cmpi slt, %2, %63 : vector<4x256xi32>
    %c1_i32_17 = arith.constant 1 : i32
    %65 = vector.broadcast %c1_i32_17 : i32 to vector<4x256xi32>
    %66 = arith.cmpi sge, %4, %65 : vector<4x256xi32>
    %67 = arith.andi %64, %66 : vector<4x256xi1>
    %cst_18 = arith.constant 0.000000e+00 : f32
    %68 = vector.broadcast %cst_18 : f32 to vector<4x256xf32>
    %69 = arith.select %67, %62, %68 : vector<4x256xi1>, vector<4x256xf32>
    %70 = vector.extract_strided_slice %5 {offsets = [0, 6], sizes = [4, 1], strides = [1, 1]} : vector<4x9xf32> to vector<4x1xf32>
    %71 = vector.broadcast %70 : vector<4x1xf32> to vector<4x256xf32>
    %72 = arith.mulf %69, %71 : vector<4x256xf32>
    %73 = arith.addf %61, %72 : vector<4x256xf32>
    %c240_i32_19 = arith.constant 240 : i32
    %74 = tpu.dynamic_rotate %1 by %c240_i32_19 dim 1 : vector<4x256xf32>, i32 -> vector<4x256xf32>
    %c240_i32_20 = arith.constant 240 : i32
    %75 = vector.broadcast %c240_i32_20 : i32 to vector<4x256xi32>
    %76 = arith.cmpi slt, %2, %75 : vector<4x256xi32>
    %cst_21 = arith.constant 0.000000e+00 : f32
    %77 = vector.broadcast %cst_21 : f32 to vector<4x256xf32>
    %78 = arith.select %76, %74, %77 : vector<4x256xi1>, vector<4x256xf32>
    %79 = vector.extract_strided_slice %5 {offsets = [0, 7], sizes = [4, 1], strides = [1, 1]} : vector<4x9xf32> to vector<4x1xf32>
    %80 = vector.broadcast %79 : vector<4x1xf32> to vector<4x256xf32>
    %81 = arith.mulf %78, %80 : vector<4x256xf32>
    %82 = arith.addf %73, %81 : vector<4x256xf32>
    %c239_i32 = arith.constant 239 : i32
    %83 = tpu.dynamic_rotate %1 by %c239_i32 dim 1 : vector<4x256xf32>, i32 -> vector<4x256xf32>
    %c240_i32_22 = arith.constant 240 : i32
    %84 = vector.broadcast %c240_i32_22 : i32 to vector<4x256xi32>
    %85 = arith.cmpi slt, %2, %84 : vector<4x256xi32>
    %c15_i32_23 = arith.constant 15 : i32
    %86 = vector.broadcast %c15_i32_23 : i32 to vector<4x256xi32>
    %87 = arith.cmpi slt, %4, %86 : vector<4x256xi32>
    %88 = arith.andi %85, %87 : vector<4x256xi1>
    %cst_24 = arith.constant 0.000000e+00 : f32
    %89 = vector.broadcast %cst_24 : f32 to vector<4x256xf32>
    %90 = arith.select %88, %83, %89 : vector<4x256xi1>, vector<4x256xf32>
    %91 = vector.extract_strided_slice %5 {offsets = [0, 8], sizes = [4, 1], strides = [1, 1]} : vector<4x9xf32> to vector<4x1xf32>
    %92 = vector.broadcast %91 : vector<4x1xf32> to vector<4x256xf32>
    %93 = arith.mulf %90, %92 : vector<4x256xf32>
    %94 = arith.addf %82, %93 : vector<4x256xf32>
    %c0_25 = arith.constant 0 : index
    %c0_26 = arith.constant 0 : index
    %95 = vector.load %arg3[%c0_25, %c0_26] : memref<4x4xf32, #tpu.memory_space<vmem>>, vector<4x4xf32>
    %96 = vector.extract_strided_slice %95 {offsets = [0, 0], sizes = [4, 1], strides = [1, 1]} : vector<4x4xf32> to vector<4x1xf32>
    %97 = vector.extract_strided_slice %94 {offsets = [0, 0], sizes = [1, 256], strides = [1, 1]} : vector<4x256xf32> to vector<1x256xf32>
    %98 = vector.broadcast %96 : vector<4x1xf32> to vector<4x256xf32>
    %99 = vector.broadcast %97 : vector<1x256xf32> to vector<4x256xf32>
    %100 = arith.mulf %98, %99 : vector<4x256xf32>
    %101 = vector.extract_strided_slice %95 {offsets = [0, 1], sizes = [4, 1], strides = [1, 1]} : vector<4x4xf32> to vector<4x1xf32>
    %102 = vector.extract_strided_slice %94 {offsets = [1, 0], sizes = [1, 256], strides = [1, 1]} : vector<4x256xf32> to vector<1x256xf32>
    %103 = vector.broadcast %101 : vector<4x1xf32> to vector<4x256xf32>
    %104 = vector.broadcast %102 : vector<1x256xf32> to vector<4x256xf32>
    %105 = arith.mulf %103, %104 : vector<4x256xf32>
    %106 = arith.addf %100, %105 : vector<4x256xf32>
    %107 = vector.extract_strided_slice %95 {offsets = [0, 2], sizes = [4, 1], strides = [1, 1]} : vector<4x4xf32> to vector<4x1xf32>
    %108 = vector.extract_strided_slice %94 {offsets = [2, 0], sizes = [1, 256], strides = [1, 1]} : vector<4x256xf32> to vector<1x256xf32>
    %109 = vector.broadcast %107 : vector<4x1xf32> to vector<4x256xf32>
    %110 = vector.broadcast %108 : vector<1x256xf32> to vector<4x256xf32>
    %111 = arith.mulf %109, %110 : vector<4x256xf32>
    %112 = arith.addf %106, %111 : vector<4x256xf32>
    %113 = vector.extract_strided_slice %95 {offsets = [0, 3], sizes = [4, 1], strides = [1, 1]} : vector<4x4xf32> to vector<4x1xf32>
    %114 = vector.extract_strided_slice %94 {offsets = [3, 0], sizes = [1, 256], strides = [1, 1]} : vector<4x256xf32> to vector<1x256xf32>
    %115 = vector.broadcast %113 : vector<4x1xf32> to vector<4x256xf32>
    %116 = vector.broadcast %114 : vector<1x256xf32> to vector<4x256xf32>
    %117 = arith.mulf %115, %116 : vector<4x256xf32>
    %118 = arith.addf %112, %117 : vector<4x256xf32>
    %c0_27 = arith.constant 0 : index
    %c0_28 = arith.constant 0 : index
    %119 = vector.load %arg4[%c0_27, %c0_28] : memref<4x1xf32, #tpu.memory_space<vmem>>, vector<4x1xf32>
    %120 = vector.broadcast %119 : vector<4x1xf32> to vector<4x256xf32>
    %121 = arith.mulf %118, %120 : vector<4x256xf32>
    %c0_29 = arith.constant 0 : index
    %c0_30 = arith.constant 0 : index
    %122 = vector.load %arg5[%c0_29, %c0_30] : memref<4x1xf32, #tpu.memory_space<vmem>>, vector<4x1xf32>
    %123 = vector.broadcast %122 : vector<4x1xf32> to vector<4x256xf32>
    %124 = arith.addf %121, %123 : vector<4x256xf32>
    %cst_31 = arith.constant 5.000000e-01 : f32
    %125 = vector.broadcast %cst_31 : f32 to vector<4x256xf32>
    %126 = arith.mulf %125, %124 : vector<4x256xf32>
    %cst_32 = arith.constant 0.707106769 : f32
    %127 = vector.broadcast %cst_32 : f32 to vector<4x256xf32>
    %128 = arith.mulf %124, %127 : vector<4x256xf32>
    %cst_33 = arith.constant 0.000000e+00 : f32
    %129 = vector.broadcast %cst_33 : f32 to vector<4x256xf32>
    %130 = arith.cmpf oge, %128, %129 : vector<4x256xf32>
    %cst_34 = arith.constant 1.000000e+00 : f32
    %cst_35 = arith.constant -1.000000e+00 : f32
    %131 = vector.broadcast %cst_34 : f32 to vector<4x256xf32>
    %132 = vector.broadcast %cst_35 : f32 to vector<4x256xf32>
    %133 = arith.select %130, %131, %132 : vector<4x256xi1>, vector<4x256xf32>
    %134 = math.absf %128 : vector<4x256xf32>
    %cst_36 = arith.constant 0.327591091 : f32
    %135 = vector.broadcast %cst_36 : f32 to vector<4x256xf32>
    %136 = arith.mulf %135, %134 : vector<4x256xf32>
    %cst_37 = arith.constant 1.000000e+00 : f32
    %137 = vector.broadcast %cst_37 : f32 to vector<4x256xf32>
    %138 = arith.addf %137, %136 : vector<4x256xf32>
    %139 = tpu.reciprocal %138 : vector<4x256xf32> -> vector<4x256xf32>
    %cst_38 = arith.constant 1.06140542 : f32
    %140 = vector.broadcast %cst_38 : f32 to vector<4x256xf32>
    %141 = arith.mulf %140, %139 : vector<4x256xf32>
    %cst_39 = arith.constant -1.45315206 : f32
    %142 = vector.broadcast %cst_39 : f32 to vector<4x256xf32>
    %143 = arith.addf %141, %142 : vector<4x256xf32>
    %144 = arith.mulf %143, %139 : vector<4x256xf32>
    %cst_40 = arith.constant 1.42141378 : f32
    %145 = vector.broadcast %cst_40 : f32 to vector<4x256xf32>
    %146 = arith.addf %144, %145 : vector<4x256xf32>
    %147 = arith.mulf %146, %139 : vector<4x256xf32>
    %cst_41 = arith.constant -0.284496725 : f32
    %148 = vector.broadcast %cst_41 : f32 to vector<4x256xf32>
    %149 = arith.addf %147, %148 : vector<4x256xf32>
    %150 = arith.mulf %149, %139 : vector<4x256xf32>
    %cst_42 = arith.constant 0.254829586 : f32
    %151 = vector.broadcast %cst_42 : f32 to vector<4x256xf32>
    %152 = arith.addf %150, %151 : vector<4x256xf32>
    %153 = arith.mulf %152, %139 : vector<4x256xf32>
    %cst_43 = arith.constant 0.000000e+00 : f32
    %154 = vector.broadcast %cst_43 : f32 to vector<4x256xf32>
    %155 = arith.subf %154, %134 : vector<4x256xf32>
    %156 = arith.mulf %155, %134 : vector<4x256xf32>
    %157 = math.exp %156 : vector<4x256xf32>
    %158 = arith.mulf %153, %157 : vector<4x256xf32>
    %cst_44 = arith.constant 1.000000e+00 : f32
    %159 = vector.broadcast %cst_44 : f32 to vector<4x256xf32>
    %160 = arith.subf %159, %158 : vector<4x256xf32>
    %161 = arith.mulf %133, %160 : vector<4x256xf32>
    %cst_45 = arith.constant 1.000000e+00 : f32
    %162 = vector.broadcast %cst_45 : f32 to vector<4x256xf32>
    %163 = arith.addf %162, %161 : vector<4x256xf32>
    %164 = arith.mulf %126, %163 : vector<4x256xf32>
    %c0_46 = arith.constant 0 : index
    %c0_47 = arith.constant 0 : index
    %165 = vector.load %arg6[%c0_46, %c0_47] : memref<4x9xf32, #tpu.memory_space<vmem>>, vector<4x9xf32>
    %cst_48 = arith.constant 0.000000e+00 : f32
    %166 = vector.broadcast %cst_48 : f32 to vector<4x256xf32>
    %c51_i32 = arith.constant 51 : i32
    %167 = tpu.dynamic_rotate %164 by %c51_i32 dim 1 : vector<4x256xf32>, i32 -> vector<4x256xf32>
    %c48_i32 = arith.constant 48 : i32
    %168 = vector.broadcast %c48_i32 : i32 to vector<4x256xi32>
    %169 = arith.cmpi sge, %2, %168 : vector<4x256xi32>
    %c3_i32 = arith.constant 3 : i32
    %170 = vector.broadcast %c3_i32 : i32 to vector<4x256xi32>
    %171 = arith.cmpi sge, %4, %170 : vector<4x256xi32>
    %172 = arith.andi %169, %171 : vector<4x256xi1>
    %cst_49 = arith.constant 0.000000e+00 : f32
    %173 = vector.broadcast %cst_49 : f32 to vector<4x256xf32>
    %174 = arith.select %172, %167, %173 : vector<4x256xi1>, vector<4x256xf32>
    %175 = vector.extract_strided_slice %165 {offsets = [0, 0], sizes = [4, 1], strides = [1, 1]} : vector<4x9xf32> to vector<4x1xf32>
    %176 = vector.broadcast %175 : vector<4x1xf32> to vector<4x256xf32>
    %177 = arith.mulf %174, %176 : vector<4x256xf32>
    %178 = arith.addf %166, %177 : vector<4x256xf32>
    %c48_i32_50 = arith.constant 48 : i32
    %179 = tpu.dynamic_rotate %164 by %c48_i32_50 dim 1 : vector<4x256xf32>, i32 -> vector<4x256xf32>
    %c48_i32_51 = arith.constant 48 : i32
    %180 = vector.broadcast %c48_i32_51 : i32 to vector<4x256xi32>
    %181 = arith.cmpi sge, %2, %180 : vector<4x256xi32>
    %cst_52 = arith.constant 0.000000e+00 : f32
    %182 = vector.broadcast %cst_52 : f32 to vector<4x256xf32>
    %183 = arith.select %181, %179, %182 : vector<4x256xi1>, vector<4x256xf32>
    %184 = vector.extract_strided_slice %165 {offsets = [0, 1], sizes = [4, 1], strides = [1, 1]} : vector<4x9xf32> to vector<4x1xf32>
    %185 = vector.broadcast %184 : vector<4x1xf32> to vector<4x256xf32>
    %186 = arith.mulf %183, %185 : vector<4x256xf32>
    %187 = arith.addf %178, %186 : vector<4x256xf32>
    %c45_i32 = arith.constant 45 : i32
    %188 = tpu.dynamic_rotate %164 by %c45_i32 dim 1 : vector<4x256xf32>, i32 -> vector<4x256xf32>
    %c48_i32_53 = arith.constant 48 : i32
    %189 = vector.broadcast %c48_i32_53 : i32 to vector<4x256xi32>
    %190 = arith.cmpi sge, %2, %189 : vector<4x256xi32>
    %c13_i32 = arith.constant 13 : i32
    %191 = vector.broadcast %c13_i32 : i32 to vector<4x256xi32>
    %192 = arith.cmpi slt, %4, %191 : vector<4x256xi32>
    %193 = arith.andi %190, %192 : vector<4x256xi1>
    %cst_54 = arith.constant 0.000000e+00 : f32
    %194 = vector.broadcast %cst_54 : f32 to vector<4x256xf32>
    %195 = arith.select %193, %188, %194 : vector<4x256xi1>, vector<4x256xf32>
    %196 = vector.extract_strided_slice %165 {offsets = [0, 2], sizes = [4, 1], strides = [1, 1]} : vector<4x9xf32> to vector<4x1xf32>
    %197 = vector.broadcast %196 : vector<4x1xf32> to vector<4x256xf32>
    %198 = arith.mulf %195, %197 : vector<4x256xf32>
    %199 = arith.addf %187, %198 : vector<4x256xf32>
    %c3_i32_55 = arith.constant 3 : i32
    %200 = tpu.dynamic_rotate %164 by %c3_i32_55 dim 1 : vector<4x256xf32>, i32 -> vector<4x256xf32>
    %c3_i32_56 = arith.constant 3 : i32
    %201 = vector.broadcast %c3_i32_56 : i32 to vector<4x256xi32>
    %202 = arith.cmpi sge, %4, %201 : vector<4x256xi32>
    %cst_57 = arith.constant 0.000000e+00 : f32
    %203 = vector.broadcast %cst_57 : f32 to vector<4x256xf32>
    %204 = arith.select %202, %200, %203 : vector<4x256xi1>, vector<4x256xf32>
    %205 = vector.extract_strided_slice %165 {offsets = [0, 3], sizes = [4, 1], strides = [1, 1]} : vector<4x9xf32> to vector<4x1xf32>
    %206 = vector.broadcast %205 : vector<4x1xf32> to vector<4x256xf32>
    %207 = arith.mulf %204, %206 : vector<4x256xf32>
    %208 = arith.addf %199, %207 : vector<4x256xf32>
    %209 = vector.extract_strided_slice %165 {offsets = [0, 4], sizes = [4, 1], strides = [1, 1]} : vector<4x9xf32> to vector<4x1xf32>
    %210 = vector.broadcast %209 : vector<4x1xf32> to vector<4x256xf32>
    %211 = arith.mulf %164, %210 : vector<4x256xf32>
    %212 = arith.addf %208, %211 : vector<4x256xf32>
    %c253_i32 = arith.constant 253 : i32
    %213 = tpu.dynamic_rotate %164 by %c253_i32 dim 1 : vector<4x256xf32>, i32 -> vector<4x256xf32>
    %c13_i32_58 = arith.constant 13 : i32
    %214 = vector.broadcast %c13_i32_58 : i32 to vector<4x256xi32>
    %215 = arith.cmpi slt, %4, %214 : vector<4x256xi32>
    %cst_59 = arith.constant 0.000000e+00 : f32
    %216 = vector.broadcast %cst_59 : f32 to vector<4x256xf32>
    %217 = arith.select %215, %213, %216 : vector<4x256xi1>, vector<4x256xf32>
    %218 = vector.extract_strided_slice %165 {offsets = [0, 5], sizes = [4, 1], strides = [1, 1]} : vector<4x9xf32> to vector<4x1xf32>
    %219 = vector.broadcast %218 : vector<4x1xf32> to vector<4x256xf32>
    %220 = arith.mulf %217, %219 : vector<4x256xf32>
    %221 = arith.addf %212, %220 : vector<4x256xf32>
    %c211_i32 = arith.constant 211 : i32
    %222 = tpu.dynamic_rotate %164 by %c211_i32 dim 1 : vector<4x256xf32>, i32 -> vector<4x256xf32>
    %c208_i32 = arith.constant 208 : i32
    %223 = vector.broadcast %c208_i32 : i32 to vector<4x256xi32>
    %224 = arith.cmpi slt, %2, %223 : vector<4x256xi32>
    %c3_i32_60 = arith.constant 3 : i32
    %225 = vector.broadcast %c3_i32_60 : i32 to vector<4x256xi32>
    %226 = arith.cmpi sge, %4, %225 : vector<4x256xi32>
    %227 = arith.andi %224, %226 : vector<4x256xi1>
    %cst_61 = arith.constant 0.000000e+00 : f32
    %228 = vector.broadcast %cst_61 : f32 to vector<4x256xf32>
    %229 = arith.select %227, %222, %228 : vector<4x256xi1>, vector<4x256xf32>
    %230 = vector.extract_strided_slice %165 {offsets = [0, 6], sizes = [4, 1], strides = [1, 1]} : vector<4x9xf32> to vector<4x1xf32>
    %231 = vector.broadcast %230 : vector<4x1xf32> to vector<4x256xf32>
    %232 = arith.mulf %229, %231 : vector<4x256xf32>
    %233 = arith.addf %221, %232 : vector<4x256xf32>
    %c208_i32_62 = arith.constant 208 : i32
    %234 = tpu.dynamic_rotate %164 by %c208_i32_62 dim 1 : vector<4x256xf32>, i32 -> vector<4x256xf32>
    %c208_i32_63 = arith.constant 208 : i32
    %235 = vector.broadcast %c208_i32_63 : i32 to vector<4x256xi32>
    %236 = arith.cmpi slt, %2, %235 : vector<4x256xi32>
    %cst_64 = arith.constant 0.000000e+00 : f32
    %237 = vector.broadcast %cst_64 : f32 to vector<4x256xf32>
    %238 = arith.select %236, %234, %237 : vector<4x256xi1>, vector<4x256xf32>
    %239 = vector.extract_strided_slice %165 {offsets = [0, 7], sizes = [4, 1], strides = [1, 1]} : vector<4x9xf32> to vector<4x1xf32>
    %240 = vector.broadcast %239 : vector<4x1xf32> to vector<4x256xf32>
    %241 = arith.mulf %238, %240 : vector<4x256xf32>
    %242 = arith.addf %233, %241 : vector<4x256xf32>
    %c205_i32 = arith.constant 205 : i32
    %243 = tpu.dynamic_rotate %164 by %c205_i32 dim 1 : vector<4x256xf32>, i32 -> vector<4x256xf32>
    %c208_i32_65 = arith.constant 208 : i32
    %244 = vector.broadcast %c208_i32_65 : i32 to vector<4x256xi32>
    %245 = arith.cmpi slt, %2, %244 : vector<4x256xi32>
    %c13_i32_66 = arith.constant 13 : i32
    %246 = vector.broadcast %c13_i32_66 : i32 to vector<4x256xi32>
    %247 = arith.cmpi slt, %4, %246 : vector<4x256xi32>
    %248 = arith.andi %245, %247 : vector<4x256xi1>
    %cst_67 = arith.constant 0.000000e+00 : f32
    %249 = vector.broadcast %cst_67 : f32 to vector<4x256xf32>
    %250 = arith.select %248, %243, %249 : vector<4x256xi1>, vector<4x256xf32>
    %251 = vector.extract_strided_slice %165 {offsets = [0, 8], sizes = [4, 1], strides = [1, 1]} : vector<4x9xf32> to vector<4x1xf32>
    %252 = vector.broadcast %251 : vector<4x1xf32> to vector<4x256xf32>
    %253 = arith.mulf %250, %252 : vector<4x256xf32>
    %254 = arith.addf %242, %253 : vector<4x256xf32>
    %c0_68 = arith.constant 0 : index
    %c0_69 = arith.constant 0 : index
    %255 = vector.load %arg7[%c0_68, %c0_69] : memref<4x4xf32, #tpu.memory_space<vmem>>, vector<4x4xf32>
    %256 = vector.extract_strided_slice %255 {offsets = [0, 0], sizes = [4, 1], strides = [1, 1]} : vector<4x4xf32> to vector<4x1xf32>
    %257 = vector.extract_strided_slice %254 {offsets = [0, 0], sizes = [1, 256], strides = [1, 1]} : vector<4x256xf32> to vector<1x256xf32>
    %258 = vector.broadcast %256 : vector<4x1xf32> to vector<4x256xf32>
    %259 = vector.broadcast %257 : vector<1x256xf32> to vector<4x256xf32>
    %260 = arith.mulf %258, %259 : vector<4x256xf32>
    %261 = vector.extract_strided_slice %255 {offsets = [0, 1], sizes = [4, 1], strides = [1, 1]} : vector<4x4xf32> to vector<4x1xf32>
    %262 = vector.extract_strided_slice %254 {offsets = [1, 0], sizes = [1, 256], strides = [1, 1]} : vector<4x256xf32> to vector<1x256xf32>
    %263 = vector.broadcast %261 : vector<4x1xf32> to vector<4x256xf32>
    %264 = vector.broadcast %262 : vector<1x256xf32> to vector<4x256xf32>
    %265 = arith.mulf %263, %264 : vector<4x256xf32>
    %266 = arith.addf %260, %265 : vector<4x256xf32>
    %267 = vector.extract_strided_slice %255 {offsets = [0, 2], sizes = [4, 1], strides = [1, 1]} : vector<4x4xf32> to vector<4x1xf32>
    %268 = vector.extract_strided_slice %254 {offsets = [2, 0], sizes = [1, 256], strides = [1, 1]} : vector<4x256xf32> to vector<1x256xf32>
    %269 = vector.broadcast %267 : vector<4x1xf32> to vector<4x256xf32>
    %270 = vector.broadcast %268 : vector<1x256xf32> to vector<4x256xf32>
    %271 = arith.mulf %269, %270 : vector<4x256xf32>
    %272 = arith.addf %266, %271 : vector<4x256xf32>
    %273 = vector.extract_strided_slice %255 {offsets = [0, 3], sizes = [4, 1], strides = [1, 1]} : vector<4x4xf32> to vector<4x1xf32>
    %274 = vector.extract_strided_slice %254 {offsets = [3, 0], sizes = [1, 256], strides = [1, 1]} : vector<4x256xf32> to vector<1x256xf32>
    %275 = vector.broadcast %273 : vector<4x1xf32> to vector<4x256xf32>
    %276 = vector.broadcast %274 : vector<1x256xf32> to vector<4x256xf32>
    %277 = arith.mulf %275, %276 : vector<4x256xf32>
    %278 = arith.addf %272, %277 : vector<4x256xf32>
    %c0_70 = arith.constant 0 : index
    %c0_71 = arith.constant 0 : index
    %279 = vector.load %arg8[%c0_70, %c0_71] : memref<4x1xf32, #tpu.memory_space<vmem>>, vector<4x1xf32>
    %280 = vector.broadcast %279 : vector<4x1xf32> to vector<4x256xf32>
    %281 = arith.mulf %278, %280 : vector<4x256xf32>
    %c0_72 = arith.constant 0 : index
    %c0_73 = arith.constant 0 : index
    %282 = vector.load %arg9[%c0_72, %c0_73] : memref<4x1xf32, #tpu.memory_space<vmem>>, vector<4x1xf32>
    %283 = vector.broadcast %282 : vector<4x1xf32> to vector<4x256xf32>
    %284 = arith.addf %281, %283 : vector<4x256xf32>
    %cst_74 = arith.constant 5.000000e-01 : f32
    %285 = vector.broadcast %cst_74 : f32 to vector<4x256xf32>
    %286 = arith.mulf %285, %284 : vector<4x256xf32>
    %cst_75 = arith.constant 0.707106769 : f32
    %287 = vector.broadcast %cst_75 : f32 to vector<4x256xf32>
    %288 = arith.mulf %284, %287 : vector<4x256xf32>
    %cst_76 = arith.constant 0.000000e+00 : f32
    %289 = vector.broadcast %cst_76 : f32 to vector<4x256xf32>
    %290 = arith.cmpf oge, %288, %289 : vector<4x256xf32>
    %cst_77 = arith.constant 1.000000e+00 : f32
    %cst_78 = arith.constant -1.000000e+00 : f32
    %291 = vector.broadcast %cst_77 : f32 to vector<4x256xf32>
    %292 = vector.broadcast %cst_78 : f32 to vector<4x256xf32>
    %293 = arith.select %290, %291, %292 : vector<4x256xi1>, vector<4x256xf32>
    %294 = math.absf %288 : vector<4x256xf32>
    %cst_79 = arith.constant 0.327591091 : f32
    %295 = vector.broadcast %cst_79 : f32 to vector<4x256xf32>
    %296 = arith.mulf %295, %294 : vector<4x256xf32>
    %cst_80 = arith.constant 1.000000e+00 : f32
    %297 = vector.broadcast %cst_80 : f32 to vector<4x256xf32>
    %298 = arith.addf %297, %296 : vector<4x256xf32>
    %299 = tpu.reciprocal %298 : vector<4x256xf32> -> vector<4x256xf32>
    %cst_81 = arith.constant 1.06140542 : f32
    %300 = vector.broadcast %cst_81 : f32 to vector<4x256xf32>
    %301 = arith.mulf %300, %299 : vector<4x256xf32>
    %cst_82 = arith.constant -1.45315206 : f32
    %302 = vector.broadcast %cst_82 : f32 to vector<4x256xf32>
    %303 = arith.addf %301, %302 : vector<4x256xf32>
    %304 = arith.mulf %303, %299 : vector<4x256xf32>
    %cst_83 = arith.constant 1.42141378 : f32
    %305 = vector.broadcast %cst_83 : f32 to vector<4x256xf32>
    %306 = arith.addf %304, %305 : vector<4x256xf32>
    %307 = arith.mulf %306, %299 : vector<4x256xf32>
    %cst_84 = arith.constant -0.284496725 : f32
    %308 = vector.broadcast %cst_84 : f32 to vector<4x256xf32>
    %309 = arith.addf %307, %308 : vector<4x256xf32>
    %310 = arith.mulf %309, %299 : vector<4x256xf32>
    %cst_85 = arith.constant 0.254829586 : f32
    %311 = vector.broadcast %cst_85 : f32 to vector<4x256xf32>
    %312 = arith.addf %310, %311 : vector<4x256xf32>
    %313 = arith.mulf %312, %299 : vector<4x256xf32>
    %cst_86 = arith.constant 0.000000e+00 : f32
    %314 = vector.broadcast %cst_86 : f32 to vector<4x256xf32>
    %315 = arith.subf %314, %294 : vector<4x256xf32>
    %316 = arith.mulf %315, %294 : vector<4x256xf32>
    %317 = math.exp %316 : vector<4x256xf32>
    %318 = arith.mulf %313, %317 : vector<4x256xf32>
    %cst_87 = arith.constant 1.000000e+00 : f32
    %319 = vector.broadcast %cst_87 : f32 to vector<4x256xf32>
    %320 = arith.subf %319, %318 : vector<4x256xf32>
    %321 = arith.mulf %293, %320 : vector<4x256xf32>
    %cst_88 = arith.constant 1.000000e+00 : f32
    %322 = vector.broadcast %cst_88 : f32 to vector<4x256xf32>
    %323 = arith.addf %322, %321 : vector<4x256xf32>
    %324 = arith.mulf %286, %323 : vector<4x256xf32>
    %c0_89 = arith.constant 0 : index
    %c0_90 = arith.constant 0 : index
    %325 = vector.load %arg10[%c0_89, %c0_90] : memref<4x4xf32, #tpu.memory_space<vmem>>, vector<4x4xf32>
    %326 = vector.extract_strided_slice %325 {offsets = [0, 0], sizes = [4, 1], strides = [1, 1]} : vector<4x4xf32> to vector<4x1xf32>
    %327 = vector.extract_strided_slice %324 {offsets = [0, 0], sizes = [1, 256], strides = [1, 1]} : vector<4x256xf32> to vector<1x256xf32>
    %328 = vector.broadcast %326 : vector<4x1xf32> to vector<4x256xf32>
    %329 = vector.broadcast %327 : vector<1x256xf32> to vector<4x256xf32>
    %330 = arith.mulf %328, %329 : vector<4x256xf32>
    %331 = vector.extract_strided_slice %325 {offsets = [0, 1], sizes = [4, 1], strides = [1, 1]} : vector<4x4xf32> to vector<4x1xf32>
    %332 = vector.extract_strided_slice %324 {offsets = [1, 0], sizes = [1, 256], strides = [1, 1]} : vector<4x256xf32> to vector<1x256xf32>
    %333 = vector.broadcast %331 : vector<4x1xf32> to vector<4x256xf32>
    %334 = vector.broadcast %332 : vector<1x256xf32> to vector<4x256xf32>
    %335 = arith.mulf %333, %334 : vector<4x256xf32>
    %336 = arith.addf %330, %335 : vector<4x256xf32>
    %337 = vector.extract_strided_slice %325 {offsets = [0, 2], sizes = [4, 1], strides = [1, 1]} : vector<4x4xf32> to vector<4x1xf32>
    %338 = vector.extract_strided_slice %324 {offsets = [2, 0], sizes = [1, 256], strides = [1, 1]} : vector<4x256xf32> to vector<1x256xf32>
    %339 = vector.broadcast %337 : vector<4x1xf32> to vector<4x256xf32>
    %340 = vector.broadcast %338 : vector<1x256xf32> to vector<4x256xf32>
    %341 = arith.mulf %339, %340 : vector<4x256xf32>
    %342 = arith.addf %336, %341 : vector<4x256xf32>
    %343 = vector.extract_strided_slice %325 {offsets = [0, 3], sizes = [4, 1], strides = [1, 1]} : vector<4x4xf32> to vector<4x1xf32>
    %344 = vector.extract_strided_slice %324 {offsets = [3, 0], sizes = [1, 256], strides = [1, 1]} : vector<4x256xf32> to vector<1x256xf32>
    %345 = vector.broadcast %343 : vector<4x1xf32> to vector<4x256xf32>
    %346 = vector.broadcast %344 : vector<1x256xf32> to vector<4x256xf32>
    %347 = arith.mulf %345, %346 : vector<4x256xf32>
    %348 = arith.addf %342, %347 : vector<4x256xf32>
    %cst_91 = arith.constant 0.000000e+00 : f32
    %349 = vector.broadcast %cst_91 : f32 to vector<4x256xf32>
    %350 = arith.maximumf %348, %349 : vector<4x256xf32>
    %cst_92 = arith.constant 5.000000e-01 : f32
    %351 = vector.broadcast %cst_92 : f32 to vector<4x256xf32>
    %352 = arith.mulf %351, %350 : vector<4x256xf32>
    %cst_93 = arith.constant 0.707106769 : f32
    %353 = vector.broadcast %cst_93 : f32 to vector<4x256xf32>
    %354 = arith.mulf %350, %353 : vector<4x256xf32>
    %cst_94 = arith.constant 0.000000e+00 : f32
    %355 = vector.broadcast %cst_94 : f32 to vector<4x256xf32>
    %356 = arith.cmpf oge, %354, %355 : vector<4x256xf32>
    %cst_95 = arith.constant 1.000000e+00 : f32
    %cst_96 = arith.constant -1.000000e+00 : f32
    %357 = vector.broadcast %cst_95 : f32 to vector<4x256xf32>
    %358 = vector.broadcast %cst_96 : f32 to vector<4x256xf32>
    %359 = arith.select %356, %357, %358 : vector<4x256xi1>, vector<4x256xf32>
    %360 = math.absf %354 : vector<4x256xf32>
    %cst_97 = arith.constant 0.327591091 : f32
    %361 = vector.broadcast %cst_97 : f32 to vector<4x256xf32>
    %362 = arith.mulf %361, %360 : vector<4x256xf32>
    %cst_98 = arith.constant 1.000000e+00 : f32
    %363 = vector.broadcast %cst_98 : f32 to vector<4x256xf32>
    %364 = arith.addf %363, %362 : vector<4x256xf32>
    %365 = tpu.reciprocal %364 : vector<4x256xf32> -> vector<4x256xf32>
    %cst_99 = arith.constant 1.06140542 : f32
    %366 = vector.broadcast %cst_99 : f32 to vector<4x256xf32>
    %367 = arith.mulf %366, %365 : vector<4x256xf32>
    %cst_100 = arith.constant -1.45315206 : f32
    %368 = vector.broadcast %cst_100 : f32 to vector<4x256xf32>
    %369 = arith.addf %367, %368 : vector<4x256xf32>
    %370 = arith.mulf %369, %365 : vector<4x256xf32>
    %cst_101 = arith.constant 1.42141378 : f32
    %371 = vector.broadcast %cst_101 : f32 to vector<4x256xf32>
    %372 = arith.addf %370, %371 : vector<4x256xf32>
    %373 = arith.mulf %372, %365 : vector<4x256xf32>
    %cst_102 = arith.constant -0.284496725 : f32
    %374 = vector.broadcast %cst_102 : f32 to vector<4x256xf32>
    %375 = arith.addf %373, %374 : vector<4x256xf32>
    %376 = arith.mulf %375, %365 : vector<4x256xf32>
    %cst_103 = arith.constant 0.254829586 : f32
    %377 = vector.broadcast %cst_103 : f32 to vector<4x256xf32>
    %378 = arith.addf %376, %377 : vector<4x256xf32>
    %379 = arith.mulf %378, %365 : vector<4x256xf32>
    %cst_104 = arith.constant 0.000000e+00 : f32
    %380 = vector.broadcast %cst_104 : f32 to vector<4x256xf32>
    %381 = arith.subf %380, %360 : vector<4x256xf32>
    %382 = arith.mulf %381, %360 : vector<4x256xf32>
    %383 = math.exp %382 : vector<4x256xf32>
    %384 = arith.mulf %379, %383 : vector<4x256xf32>
    %cst_105 = arith.constant 1.000000e+00 : f32
    %385 = vector.broadcast %cst_105 : f32 to vector<4x256xf32>
    %386 = arith.subf %385, %384 : vector<4x256xf32>
    %387 = arith.mulf %359, %386 : vector<4x256xf32>
    %cst_106 = arith.constant 1.000000e+00 : f32
    %388 = vector.broadcast %cst_106 : f32 to vector<4x256xf32>
    %389 = arith.addf %388, %387 : vector<4x256xf32>
    %390 = arith.mulf %352, %389 : vector<4x256xf32>
    %391 = arith.mulf %390, %1 : vector<4x256xf32>
    %c0_107 = arith.constant 0 : index
    %c0_108 = arith.constant 0 : index
    %c0_109 = arith.constant 0 : index
    %392 = vector.load %arg11[%c0_107, %c0_108, %c0_109] : memref<1x4x256xf32, #tpu.memory_space<vmem>>, vector<1x4x256xf32>
    %393 = vector.shape_cast %392 : vector<1x4x256xf32> to vector<4x256xf32>
    %394 = vector.shape_cast %391 : vector<4x256xf32> to vector<1x4x256xf32>
    tpu.vector_store %arg11[%c0_107, %c0_108, %c0_109], %394 {strides = array<i32>} : memref<1x4x256xf32, #tpu.memory_space<vmem>>, vector<1x4x256xf32>,
    return
  }
  func.func @transform_0(%arg0: i32) -> (i32, i32, i32) {
    %c0_i32 = arith.constant 0 : i32
    %c0_i32_0 = arith.constant 0 : i32
    %c0_i32_1 = arith.constant 0 : i32
    return %arg0, %c0_i32, %c0_i32_0 : i32, i32, i32
  }
  func.func @transform_1(%arg0: i32) -> (i32, i32) {
    %c0_i32 = arith.constant 0 : i32
    %c0_i32_0 = arith.constant 0 : i32
    %c0_i32_1 = arith.constant 0 : i32
    return %c0_i32, %c0_i32_0 : i32, i32
  }
  func.func @transform_2(%arg0: i32) -> (i32, i32) {
    %c0_i32 = arith.constant 0 : i32
    %c0_i32_0 = arith.constant 0 : i32
    %c0_i32_1 = arith.constant 0 : i32
    return %c0_i32, %c0_i32_0 : i32, i32
  }
  func.func @transform_3(%arg0: i32) -> (i32, i32) {
    %c0_i32 = arith.constant 0 : i32
    %c0_i32_0 = arith.constant 0 : i32
    %c0_i32_1 = arith.constant 0 : i32
    return %c0_i32, %c0_i32_0 : i32, i32
  }
  func.func @transform_4(%arg0: i32) -> (i32, i32) {
    %c0_i32 = arith.constant 0 : i32
    %c0_i32_0 = arith.constant 0 : i32
    %c0_i32_1 = arith.constant 0 : i32
    return %c0_i32, %c0_i32_0 : i32, i32
  }
  func.func @transform_5(%arg0: i32) -> (i32, i32) {
    %c0_i32 = arith.constant 0 : i32
    %c0_i32_0 = arith.constant 0 : i32
    %c0_i32_1 = arith.constant 0 : i32
    return %c0_i32, %c0_i32_0 : i32, i32
  }
  func.func @transform_6(%arg0: i32) -> (i32, i32) {
    %c0_i32 = arith.constant 0 : i32
    %c0_i32_0 = arith.constant 0 : i32
    %c0_i32_1 = arith.constant 0 : i32
    return %c0_i32, %c0_i32_0 : i32, i32
  }
  func.func @transform_7(%arg0: i32) -> (i32, i32) {
    %c0_i32 = arith.constant 0 : i32
    %c0_i32_0 = arith.constant 0 : i32
    %c0_i32_1 = arith.constant 0 : i32
    return %c0_i32, %c0_i32_0 : i32, i32
  }
  func.func @transform_8(%arg0: i32) -> (i32, i32) {
    %c0_i32 = arith.constant 0 : i32
    %c0_i32_0 = arith.constant 0 : i32
    %c0_i32_1 = arith.constant 0 : i32
    return %c0_i32, %c0_i32_0 : i32, i32
  }
  func.func @transform_9(%arg0: i32) -> (i32, i32) {
    %c0_i32 = arith.constant 0 : i32
    %c0_i32_0 = arith.constant 0 : i32
    %c0_i32_1 = arith.constant 0 : i32
    return %c0_i32, %c0_i32_0 : i32, i32
  }
  func.func @transform_10(%arg0: i32) -> (i32, i32, i32) {
    %c0_i32 = arith.constant 0 : i32
    %c0_i32_0 = arith.constant 0 : i32
    %c0_i32_1 = arith.constant 0 : i32
    return %arg0, %c0_i32, %c0_i32_0 : i32, i32, i32
  }
}

</mosaic_0001>

<bundles_post_ra>
// kernel: tpu_custom_call.1
= control target key start
LH: loop header
LB: loop body
LE: loop exit
PB: predicated region body
PF: predicated region fallthrough
CT: control target
= control target key end

     0   :  { %15 = vsyncpa [#allocation3], 0  ;;  %s1890_s0 = inlined_call_operand.vmem [shape: f32[2,4,256], index: 0, kind: input, shape index: {}]   ;;  %s1891_s1 = inlined_call_operand.vmem [shape: f32[4,9], index: 1, kind: input, shape index: {}]   ;;  %s1892_s2 = inlined_call_operand.vmem [shape: f32[4,4], index: 2, kind: input, shape index: {}]   ;;  %s1893_s3 = inlined_call_operand.vmem [shape: f32[4,1], index: 3, kind: input, shape index: {}]   ;;  %s1894_s4 = inlined_call_operand.vmem [shape: f32[4,1], index: 4, kind: input, shape index: {}]   ;;  %s1895_s5 = inlined_call_operand.vmem [shape: f32[4,9], index: 5, kind: input, shape index: {}]   ;;  %s1896_s6 = inlined_call_operand.vmem [shape: f32[4,4], index: 6, kind: input, shape index: {}]   ;;  %s1897_s7 = inlined_call_operand.vmem [shape: f32[4,1], index: 7, kind: input, shape index: {}]   ;;  %s1898_s8 = inlined_call_operand.vmem [shape: f32[4,1], index: 8, kind: input, shape index: {}]   ;;  %s1899_s9 = inlined_call_operand.vmem [shape: f32[4,4], index: 9, kind: input, shape index: {}]   ;;  %s1900_s10 = inlined_call_operand.hbm [shape: f32[2,4,256], index: 10, kind: output, shape index: {}]  }
   0x1   :  { %17 = vsyncpa [#allocation3 + $0x1], 0  ;;  %s1445_s13 = smov 0   ;;  %s1447_s14 = smov 0  }
   0x2   :  { %s1449_s15 = smov 0   ;;  %s1451_s16 = smov 0  }
   0x3 LB: > { %s1466_s17 = sadd.s32 4294967295, %s1360_s16   ;;  %s1163_s18 = sadd.s32 4294967294, %s1360_s16   ;;  %s1360_s16 = sphi %s1451_s16, %s1918_s16   ;;  %s1356_s15 = sphi %s1449_s15, %s1917_s15   ;;  %s1352_s14 = sphi %s1447_s14, %s1916_s14   ;;  %s1348_s13 = sphi %s1445_s13, %s1915_s13  }
   0x4   : > { %s1470_s19 = sadd.s32 1, %s1360_s16   ;;  %s245_s20 = sadd.s32 1, %s1356_s15 }
   0x5   : > { %s242_s21 = ssub.s32 %s1360_s16, %s1470_s19  ;;  %p255_p0 = scmp.ne.s32.totalorder %s1356_s15, %s1352_s14 }
   0x6   : > { %p243_p1 = scmp.eq.s32.totalorder %s242_s21, 0  ;;  %p256_p2 = scmp.eq.s32.totalorder %s1466_s17, 1 }
   0x7   : > { %p261_p3 = scmp.ne.s32.totalorder %s1352_s14, %s1348_s13  ;;  %p262_p4 = scmp.eq.s32.totalorder %s1163_s18, 1 }
   0x8   : > { %s1481_s22 = scalar_select %p243_p1, %s1356_s15, %s245_s20  }
   0x9   : > { %p1483_p5 = por %p256_p2, %p255_p0  ;;  %p1487_p6 = por %p262_p4, %p261_p3 }
   0xa   : > { %p1166_p7 = scmp.ge.s32.totalorder %s1360_s16, 1  ;;  %p315_p8 = scmp.lt.s32.totalorder %s1360_s16, 3 }
   0xc   : > { %p316_p9 = pnand %p1166_p7, %p315_p8 }
   0xd   : > { %v364_v0 = vld [vmem:[%s1891_s1] sm:$0xf] (!%p316_p9)  ;;  %p353_p10 = scmp.lt.s32.totalorder (!%p316_p9), %s1466_s17, 1  ;;  %v1362_v1 = vmov (!%p316_p9), 2   ;;  %v1363_v2 = vmov (!%p316_p9), 1   ;;  %v1364_v3 = vmov (!%p316_p9), 4   ;;  %v359_v24 = vlaneseq (!%p316_p9) }
   0xe   : > { %319 = sbr.rel (%p316_p9) target bundleno = 581 (0x245), region = 60  ;;  %1244 = vset.pattern.permute.xlu1 (!%p316_p9), %v1362_v1  ;;  %1243 = vset.pattern.permute.xlu0 (!%p316_p9), %v1363_v2  ;;  %v1365_v5 = vmov (!%p316_p9), 5   ;;  %s1366_s12 = smov (!%p316_p9), 17   ;;  %v1367_v6 = vmov (!%p316_p9), 3   ;;  %v1370_v8 = vmov (!%p316_p9), 7   ;;  %v1371_v9 = vmov (!%p316_p9), 6  }
   0xf   : > { %423 = vperm.xlu1 (!%p316_p9), %1244, %v364_v0   ;;  %402 = vperm.xlu0 (!%p316_p9), %1243, %v364_v0   ;;  %s1368_s18 = smov (!%p316_p9), 16   ;;  %s1369_s20 = smov (!%p316_p9), 15   ;;  %v1372_v10 = vmov (!%p316_p9), 0   ;;  %v1377_v11 = vmov (!%p316_p9), 8   ;;  %v538_v12 = vld [vmem:[%s1892_s2] sm:$0xf] (!%p316_p9) }
  0x10   : > { %s1373_s21 = smov (!%p316_p9), 1   ;;  %s1374_s25 = smov (!%p316_p9), 127   ;;  %v670_v13 = vld [vmem:[%s1895_s5] sm:$0xf] (!%p316_p9)  ;;  %v1556_v25 = vand.u32 (!%p316_p9), 127, %v359_v24  ;;  %v1588_v42 = vshrl.u32 (!%p316_p9), %v359_v24, 7 }
  0x11   : > { %s1375_s26 = smov (!%p316_p9), 113   ;;  %v602_v14 = vld [vmem:[%s1893_s3] sm:$0xf] (!%p316_p9)  ;;  %v1379_v34 = vmov (!%p316_p9), 839922192   ;;  %s1383_s29 = smov (!%p316_p9), 125  }
  0x12   : > { %v610_v15 = vld [vmem:[%s1894_s4] sm:$0xf] (!%p316_p9)  ;;  %v1561_v28 = vadd.s32 (!%p316_p9), 128, %v1556_v25  ;;  %v1564_v29 = vand.u32 (!%p316_p9), 15, %v1556_v25  ;;  %vm372_vm0 = vcmp.lt.s32.totalorder (!%p316_p9), %v1556_v25, 17  ;;  %vm375_vm1 = vcmp.ge.s32.totalorder (!%p316_p9), %v1556_v25, 16 }
  0x13   : > { %1245 = vset.pattern.permute.xlu1 (!%p316_p9), %v1364_v3  ;;  %1247 = vset.pattern.permute.xlu0 (!%p316_p9), %v1365_v5  ;;  %vm396_vm2 = vcmp.lt.s32.totalorder (!%p316_p9), %v1556_v25, 16  ;;  %v451_v35 = vunpack.c.l.s4 (!%p316_p9), %v1379_v34  ;;  %vm413_vm5 = vcmp.lt.s32.totalorder (!%p316_p9), %v1556_v25, 15  ;;  %vm434_vm8 = vcmp.lt.s32.totalorder (!%p316_p9), %v1556_v25, 1  ;;  %s1384_s30 = smov (!%p316_p9), 83  }
  0x14   : > { %448 = vperm.xlu1 (!%p316_p9), %1245, %v364_v0   ;;  %v1572_v32 = vand.u32 (!%p316_p9), 15, %v1561_v28  ;;  %vm377_vm3 = vcmp.ge.s32.totalorder (!%p316_p9), %v1564_v29, 1  ;;  %vm416_vm6 = vcmp.lt.s32.totalorder (!%p316_p9), %v1564_v29, 15  ;;  %vm468_vm11 = vcmp.lt.s32.totalorder (!%p316_p9), %v1556_v25, 127 }
  0x15   : > { %s354_s27 = scalar_select %p353_p10, %s1466_s17, 1  ;;  %vm1581_vm4 = vmand %vm375_vm1, %vm377_vm3  ;;  %v452_v43 = vunpack.c.0.s8 %v451_v35  ;;  %vm489_vm12 = vcmp.lt.s32.totalorder %v1561_v28, 240  ;;  %vm485_vm13 = vcmp.lt.s32.totalorder %v1556_v25, 113  ;;  %vm506_vm15 = vcmp.lt.s32.totalorder %v1556_v25, 112 }
  0x16   : > { %vm378_vm7 = vcmp.ge.s32.totalorder %v1572_v32, 1  ;;  %vm1601_vm9 = vmand %vm375_vm1, %vm416_vm6  ;;  %vm417_vm10 = vcmp.lt.s32.totalorder %v1572_v32, 15 }
  0x17   : > { %s1175_s28 = sshll.u32 %s354_s27, 3  ;;  %s1376_s27 = smov 112   ;;  %v455_v56 = vsub.s32 %v452_v43, %v1588_v42  ;;  %vm1636_vm14 = vmand %vm489_vm12, %vm378_vm7 }
  0x18   : > { %s1503_s11 = scalar_lea.vmem %s1890_s0, %s1175_s28  ;;  %1246 = vset.pattern.permute.xlu1 %v1367_v6  ;;  %s1378_s28 = smov 111  }
  0x19   : > { %v1506_v4 = vld [vmem:[%s1503_s11] sm:$0xff]  ;;  %440 = vperm.xlu1 %1246, %v364_v0  }
  0x1a   : > { %368 = vrot.lane.b32.xlu0 %v1506_v4, %s1366_s12  ;;  %v1513_v7 = vcombine.high %v1506_v4, %v1506_v4 }
  0x1d   : > { %370 = vrot.lane.b32.xlu1 %v1513_v7, %s1366_s12  ;;  %s1385_s12 = smov 80  }
  0x1e   : > { %392 = vrot.lane.b32.xlu0 %v1506_v4, %s1368_s18  ;;  %1250 = vset.pattern.permute.xlu1 %v1370_v8 }
  0x21   : > { %394 = vrot.lane.b32.xlu1 %v1513_v7, %s1368_s18  ;;  %s1386_s18 = smov 45  }
  0x22   : > { %409 = vrot.lane.b32.xlu0 %v1506_v4, %s1369_s20 }
  0x25   : > { %411 = vrot.lane.b32.xlu1 %v1513_v7, %s1369_s20  ;;  %s1387_s20 = smov 77  }
  0x26   : > { %474 = vperm.xlu0 %1247, %v364_v0  }
  0x29   : > { %430 = vrot.lane.b32.xlu1 %v1506_v4, %s1373_s21 }
  0x2a   : > { %1248 = vset.pattern.permute.xlu0 %v1371_v9 }
  0x2b   : > { %495 = vperm.xlu0 %1248, %v364_v0  }
  0x2d   : > { %432 = vrot.lane.b32.xlu1 %v1513_v7, %s1373_s21 }
  0x2f   : > { %1249 = vset.pattern.permute.xlu0 %v1372_v10 }
  0x30   : > { %385 = vperm.xlu0 %1249, %v364_v0  }
  0x31   : > { %512 = vperm.xlu1 %1250, %v364_v0  }
  0x34   : > { %466 = vrot.lane.b32.xlu0 %v1513_v7, %s1374_s25 }
  0x35   : > { %464 = vrot.lane.b32.xlu1 %v1506_v4, %s1374_s25  ;;  %s1176_s25 = sshll.u32 %s1466_s17, 7  ;;  %s1389_s17 = smov [#allocation2]  }
  0x36   : > { %1251 = vset.pattern.permute.xlu1 %v1377_v11  ;;  %s1848_s21 = scalar_lea.hbm %s1900_s10, %s1176_s25 }
  0x38   : > { %481 = vrot.lane.b32.xlu0 %v1506_v4, %s1375_s26 }
  0x39   : > { %531 = vperm.xlu1 %1251, %v364_v0  }
  0x3c   : > { %502 = vrot.lane.b32.xlu0 %v1506_v4, %s1376_s27 }
  0x3d   : > { %483 = vrot.lane.b32.xlu1 %v1513_v7, %s1375_s26  ;;  %s1388_s26 = smov 3  }
  0x3e   : > { %1252 = vset.pattern.permute.xlu1 %v1363_v2 }
  0x40   : > { %519 = vrot.lane.b32.xlu0 %v1506_v4, %s1378_s28 }
  0x41   : > { %504 = vrot.lane.b32.xlu1 %v1513_v7, %s1376_s27  ;;  %s1381_s27 = smov 48  }
  0x44   : > { %541 = vperm.xlu0 %1249, %v538_v12  }
  0x45   : > { %521 = vrot.lane.b32.xlu1 %v1513_v7, %s1378_s28  ;;  %s1382_s28 = smov 51  }
  0x48   : > { %1254 = vset.pattern.permute.xlu0 %v1367_v6 }
  0x49   : > { %587 = vperm.xlu0 %1254, %v538_v12   ;;  %555 = vperm.xlu1 %1252, %v538_v12  }
  0x4d   : > { %743 = vperm.xlu0 %1254, %v670_v13   ;;  %1253 = vset.pattern.permute.xlu1 %v1362_v1 }
  0x4e   : > { %571 = vperm.xlu1 %1253, %v538_v12  }
  0x51   : > { %1258 = vset.pattern.permute.xlu0 %v1364_v3 }
  0x52   : > { %751 = vperm.xlu0 %1258, %v670_v13   ;;  %1255 = vset.pattern.permute.xlu1 %v1372_v10 }
  0x53   : > { %605 = vperm.xlu1 %1255, %v602_v14  }
  0x56   : > { %1259 = vset.pattern.permute.xlu0 %v1365_v5 }
  0x57   : > { %768 = vperm.xlu0 %1259, %v670_v13   ;;  %613 = vperm.xlu1 %1255, %v610_v15  }
  0x5b   : > { %1260 = vset.pattern.permute.xlu0 %v1371_v9  ;;  %1256 = vset.pattern.permute.xlu1 %v1363_v2 }
  0x5c   : > { %789 = vperm.xlu0 %1260, %v670_v13   ;;  %705 = vperm.xlu1 %1256, %v670_v13  }
  0x60   : > { %1261 = vset.pattern.permute.xlu0 %v1372_v10  ;;  %1257 = vset.pattern.permute.xlu1 %v1362_v1 }
  0x61   : > { %688 = vperm.xlu0 %1261, %v670_v13   ;;  %726 = vperm.xlu1 %1257, %v670_v13  }
  0x65   : > { %1262 = vset.pattern.permute.xlu1 %v1370_v8 }
  0x66   : > { %806 = vperm.xlu1 %1262, %v670_v13  }
  0x6a   : > { %1263 = vset.pattern.permute.xlu1 %v1377_v11 }
  0x6b   : > { %825 = vperm.xlu1 %1263, %v670_v13  }
  0x6f   : > { %1264 = vset.pattern.permute.xlu1 %v1363_v2 }
  0x8e   : > { %v1550_v16 = vpop.permute.xlu1 %423  ;;  %v403_v17 = vpop.permute.xlu0 %402 }
  0x92   : > { %v369_v18 = vpop.permute.xlu0 %368 }
  0x93   : > { %v1552_v19 = vpop.permute.xlu1 %448 }
  0x94   : > { %v456_v9 = vrot.slane %v1552_v19, %v455_v56 }
  0x96   : > { %v393_v20 = vpop.permute.xlu0 %392 }
  0x98   : > { %v1554_v21 = vpop.permute.xlu1 %440 }
  0x9a   : > { %v410_v22 = vpop.permute.xlu0 %409 }
  0x9c   : > { %v371_v23 = vpop.permute.xlu1 %370 }
  0x9d   : > { %v374_v36 = vsel %vm372_vm0, %v371_v23, %v369_v18  ;;  %v373_v39 = vsel %vm372_vm0, %v369_v18, %v371_v23  ;;  %v458_v23 = vmul.f32 %v456_v9, %v1506_v4  ;;  %vm523_vm0 = vcmp.lt.s32.totalorder %v1556_v25, 111 }
  0x9e   : > { %v381_v45 = vsel %vm1581_vm4, %v374_v36, 0.0  ;;  %v382_v49 = vsel %vm378_vm7, %v373_v39, 0.0  ;;  %vm699_vm4 = vcmp.lt.s32.totalorder %v1556_v25, 48 }
  0x9f   : > { %v460_v35 = vcombine.high %v458_v23, %v458_v23 }
  0xa0   : > { %v395_v26 = vpop.permute.xlu1 %394 }
  0xa1   : > { %v398_v37 = vsel %vm396_vm2, %v395_v26, %v393_v20  ;;  %v397_v46 = vsel %vm396_vm2, %v393_v20, %v395_v26 }
  0xa2   : > { %v399_v44 = vsel %vm375_vm1, %v398_v37, 0.0  ;;  %v406_v57 = vmul.f32 %v403_v17, %v397_v46  ;;  %vm527_vm1 = vmand %vm489_vm12, %vm417_vm10 }
  0xa3   : > { %v405_v54 = vmul.f32 %v403_v17, %v399_v44 }
  0xa4   : > { %v412_v30 = vpop.permute.xlu1 %411 }
  0xa5   : > { %v1558_v27 = vpop.permute.xlu0 %474  ;;  %v415_v48 = vsel %vm413_vm5, %v412_v30, %v410_v22  ;;  %v414_v51 = vsel %vm413_vm5, %v410_v22, %v412_v30  ;;  %vm678_vm5 = vcmp.ge.s32.totalorder %v1556_v25, 48 }
  0xa6   : > { %v420_v58 = vsel %vm1601_vm9, %v415_v48, 0.0  ;;  %v421_v61 = vsel %vm417_vm10, %v414_v51, 0.0  ;;  %vm719_vm9 = vcmp.lt.s32.totalorder %v1564_v29, 13 }
  0xa7   : > { %v426_v5 = vmul.f32 %v1550_v16, %v420_v58  ;;  %v427_v11 = vmul.f32 %v1550_v16, %v421_v61  ;;  %v1664_v61 = vsub.s32 1, %v1588_v42 }
  0xa8   : > { %v431_v33 = vpop.permute.xlu1 %430 }
  0xaa   : > { %v1566_v31 = vpop.permute.xlu0 %495 }
  0xac   : > { %v433_v41 = vpop.permute.xlu1 %432 }
  0xad   : > { %v436_v55 = vsel %vm434_vm8, %v433_v41, %v431_v33  ;;  %v435_v59 = vsel %vm434_vm8, %v431_v33, %v433_v41  ;;  %vm716_vm8 = vcmp.lt.s32.totalorder %v1556_v25, 45 }
  0xae   : > { %v437_v0 = vsel %vm377_vm3, %v436_v55, 0.0  ;;  %v438_v8 = vsel %vm378_vm7, %v435_v59, 0.0  ;;  %vm675_vm7 = vcmp.lt.s32.totalorder %v1556_v25, 51 }
  0xaf   : > { %v386_v40 = vpop.permute.xlu0 %385  ;;  %v443_v13 = vmul.f32 %v1554_v21, %v437_v0  ;;  %v444_v17 = vmul.f32 %v1554_v21, %v438_v8  ;;  %v1670_v8 = vsub.s32 2, %v1588_v42 }
  0xb0   : > { %v388_v50 = vmul.f32 %v386_v40, %v381_v45  ;;  %v389_v52 = vmul.f32 %v386_v40, %v382_v49  ;;  %v513_v53 = vpop.permute.xlu1 %512 }
  0xb2   : > { %v407_v62 = vadd.f32 %v405_v54, %v388_v50  ;;  %v408_v63 = vadd.f32 %v406_v57, %v389_v52 }
  0xb3   : > { %v467_v60 = vpop.permute.xlu0 %466 }
  0xb4   : > { %v465_v3 = vpop.permute.xlu1 %464  ;;  %v428_v12 = vadd.f32 %v426_v5, %v407_v62  ;;  %v429_v15 = vadd.f32 %v427_v11, %v408_v63  ;;  %v1667_v5 = vsub.s32 3, %v1588_v42 }
  0xb5   : > { %v469_v14 = vsel %vm468_vm11, %v465_v3, %v467_v60  ;;  %v470_v22 = vsel %vm468_vm11, %v467_v60, %v465_v3  ;;  %v1661_v60 = vsub.s32 0, %v1588_v42  ;;  %vm737_vm11 = vcmp.lt.s32.totalorder %v1556_v25, 3 }
  0xb6   : > { %v471_v24 = vsel %vm416_vm6, %v469_v14, 0.0  ;;  %v445_v16 = vadd.f32 %v443_v13, %v428_v12  ;;  %v446_v21 = vadd.f32 %v444_v17, %v429_v15  ;;  %v472_v26 = vsel %vm417_vm10, %v470_v22, 0.0 }
  0xb7   : > { %v482_v18 = vpop.permute.xlu0 %481  ;;  %v477_v4 = vmul.f32 %v1558_v27, %v471_v24  ;;  %v478_v40 = vmul.f32 %v1558_v27, %v472_v26 }
  0xb8   : > { %v532_v20 = vpop.permute.xlu1 %531  ;;  %v462_v39 = vadd.f32 %v458_v23, %v445_v16  ;;  %v463_v43 = vadd.f32 %v460_v35, %v446_v21 }
  0xba   : > { %v479_v45 = vadd.f32 %v477_v4, %v462_v39  ;;  %v480_v50 = vadd.f32 %v478_v40, %v463_v43 }
  0xbb   : > { %v503_v36 = vpop.permute.xlu0 %502 }
  0xbc   : > { %v484_v30 = vpop.permute.xlu1 %483 }
  0xbd   : > { %v486_v33 = vsel %vm485_vm13, %v482_v18, %v484_v30  ;;  %v487_v34 = vsel %vm485_vm13, %v484_v30, %v482_v18  ;;  %vm681_vm13 = vcmp.ge.s32.totalorder %v1572_v32, 3 }
  0xbe   : > { %v492_v37 = vsel %vm377_vm3, %v486_v33, 0.0  ;;  %v493_v38 = vsel %vm1636_vm14, %v487_v34, 0.0  ;;  %vm720_vm14 = vcmp.lt.s32.totalorder %v1572_v32, 13 }
  0xbf   : > { %v498_v41 = vmul.f32 %v1566_v31, %v492_v37  ;;  %v499_v46 = vmul.f32 %v1566_v31, %v493_v38  ;;  %v520_v27 = vpop.permute.xlu0 %519 }
  0xc0   : > { %v505_v44 = vpop.permute.xlu1 %504 }
  0xc1   : > { %v507_v47 = vsel %vm506_vm15, %v503_v36, %v505_v44  ;;  %v508_v48 = vsel %vm506_vm15, %v505_v44, %v503_v36  ;;  %v500_v51 = vadd.f32 %v498_v41, %v479_v45  ;;  %v501_v56 = vadd.f32 %v499_v46, %v480_v50 }
  0xc2   : > { %v510_v49 = vsel %vm489_vm12, %v508_v48, 0.0  ;;  %v515_v52 = vmul.f32 %v513_v53, %v507_v47  ;;  %vm1748_vm12 = vmand %vm678_vm5, %vm719_vm9  ;;  %vm762_vm15 = vcmp.lt.s32.totalorder %v1556_v25, 125 }
  0xc3   : > { %v516_v54 = vmul.f32 %v513_v53, %v510_v49  ;;  %v542_v12 = vpop.permute.xlu0 %541 }
  0xc4   : > { %v522_v55 = vpop.permute.xlu1 %521  ;;  %v517_v53 = vadd.f32 %v515_v52, %v500_v51 }
  0xc5   : > { %v524_v31 = vsel %vm523_vm0, %v520_v27, %v522_v55  ;;  %v525_v57 = vsel %vm523_vm0, %v522_v55, %v520_v27  ;;  %v518_v62 = vadd.f32 %v516_v54, %v501_v56  ;;  %vm779_vm0 = vcmp.lt.s32.totalorder %v1556_v25, 83 }
  0xc6   : > { %v528_v58 = vsel %vm416_vm6, %v524_v31, 0.0  ;;  %v529_v59 = vsel %vm527_vm1, %v525_v57, 0.0  ;;  %vm680_vm6 = vcmp.ge.s32.totalorder %v1564_v29, 3  ;;  %vm783_vm1 = vcmp.lt.s32.totalorder %v1561_v28, 208 }
  0xc7   : > { %v534_v63 = vmul.f32 %v532_v20, %v528_v58  ;;  %v535_v0 = vmul.f32 %v532_v20, %v529_v59  ;;  %vm1741_vm10 = vmand %vm678_vm5, %vm680_vm6 }
  0xc8   : > { %v556_v3 = vpop.permute.xlu1 %555  ;;  %v588_v26 = vpop.permute.xlu0 %587 }
  0xc9   : > { %v536_v9 = vadd.f32 %v534_v63, %v517_v53  ;;  %v537_v11 = vadd.f32 %v535_v0, %v518_v62 }
  0xcb   : > { %v547_v13 = vrot.slane %v536_v9, %v1661_v60  ;;  %v551_v14 = vrot.slane %v537_v11, %v1661_v60  ;;  %v561_v15 = vrot.slane %v536_v9, %v1664_v61  ;;  %v565_v17 = vrot.slane %v537_v11, %v1664_v61 }
  0xcc   : > { %v593_v18 = vrot.slane %v536_v9, %v1667_v5  ;;  %v597_v20 = vrot.slane %v537_v11, %v1667_v5  ;;  %v577_v22 = vrot.slane %v536_v9, %v1670_v8  ;;  %v581_v42 = vrot.slane %v537_v11, %v1670_v8 }
  0xcd   : > { %v552_v23 = vmul.f32 %v547_v13, %v542_v12  ;;  %v553_v24 = vmul.f32 %v551_v14, %v542_v12  ;;  %v566_v16 = vmul.f32 %v561_v15, %v556_v3  ;;  %v567_v19 = vmul.f32 %v565_v17, %v556_v3  ;;  %v572_v21 = vpop.permute.xlu1 %571 }
  0xce   : > { %v582_v30 = vmul.f32 %v577_v22, %v572_v21  ;;  %v583_v4 = vmul.f32 %v581_v42, %v572_v21  ;;  %v598_v35 = vmul.f32 %v593_v18, %v588_v26  ;;  %v599_v36 = vmul.f32 %v597_v20, %v588_v26 }
  0xcf   : > { %v568_v33 = vadd.f32 %v566_v16, %v552_v23  ;;  %v569_v34 = vadd.f32 %v567_v19, %v553_v24 }
  0xd1   : > { %v584_v37 = vadd.f32 %v582_v30, %v568_v33  ;;  %v585_v38 = vadd.f32 %v583_v4, %v569_v34 }
  0xd2   : > { %v606_v39 = vpop.permute.xlu1 %605 }
  0xd3   : > { %v600_v40 = vadd.f32 %v598_v35, %v584_v37  ;;  %v601_v41 = vadd.f32 %v599_v36, %v585_v38  ;;  %v1380_v35 = vmov -1.0  }
  0xd5   : > { %v608_v43 = vmul.f32 %v606_v39, %v600_v40  ;;  %v609_v44 = vmul.f32 %v606_v39, %v601_v41 }
  0xd6   : > { %v614_v45 = vpop.permute.xlu1 %613 }
  0xd7   : > { %v616_v46 = vadd.f32 %v614_v45, %v608_v43  ;;  %v617_v47 = vadd.f32 %v614_v45, %v609_v44 }
  0xd9   : > { %v620_v48 = vmul.f32 0.70710677, %v616_v46  ;;  %v621_v49 = vmul.f32 0.70710677, %v617_v47  ;;  %v618_v41 = vmul.f32 0.5, %v616_v46 }
  0xda   : > { %v832_v46 = vld [vmem:[%s1896_s6] sm:$0xf] }
  0xdb   : > { %v626_v50 = vand.u32 2147483647, %v620_v48  ;;  %v627_v51 = vand.u32 2147483647, %v621_v49  ;;  %vm622_vm2 = vcmp.ge.f32.partialorder %v620_v48, 0.0  ;;  %vm623_vm3 = vcmp.ge.f32.partialorder %v621_v49, 0.0 }
  0xdc   : > { %v624_v36 = vsel %vm622_vm2, 1.0, %v1380_v35  ;;  %v625_v38 = vsel %vm623_vm3, 1.0, %v1380_v35  ;;  %v896_v49 = vld [vmem:[%s1897_s7] sm:$0xf]  ;;  %vm800_vm2 = vcmp.lt.s32.totalorder %v1556_v25, 80  ;;  %vm1786_vm3 = vmand %vm783_vm1, %vm681_vm13 }
  0xdd   : > { %v628_v52 = vmul.f32 0.3275911, %v626_v50  ;;  %v629_v54 = vmul.f32 0.3275911, %v627_v51  ;;  %v652_v56 = vsub.f32 0.0, %v626_v50  ;;  %v653_v31 = vsub.f32 0.0, %v627_v51 }
  0xdf   : > { %v630_v27 = vadd.f32 1.0, %v628_v52  ;;  %v631_v55 = vadd.f32 1.0, %v629_v54  ;;  %v654_v58 = vmul.f32 %v652_v56, %v626_v50  ;;  %v655_v62 = vmul.f32 %v653_v31, %v627_v51  ;;  %v706_v51 = vpop.permute.xlu1 %705  ;;  %v744_v56 = vpop.permute.xlu0 %743 }
  0xe0   : > { %v619_v50 = vmul.f32 0.5, %v617_v47  ;;  %v964_v47 = vld [vmem:[%s1899_s9] sm:$0xf] }
  0xe1   : > { %1273 = vrcp.f32 %v630_v27  ;;  %v656_v9 = vmul.f32 1.442695, %v654_v58  ;;  %v658_v12 = vmul.f32 1.442695, %v655_v62 }
  0xe2   : > { %1275 = vrcp.f32 %v631_v55 }
  0xe3   : > { %1277 = vpow2.f32 %v656_v9  ;;  %v727_v52 = vpop.permute.xlu1 %726 }
  0xe4   : > { %1279 = vpow2.f32 %v658_v12 }
  0xe7   : > { %v1721_v54 = vpop.permute.xlu1 %806 }
  0xeb   : > { %v1274_v57 = vpop.eup %1273  ;;  %v1723_v27 = vpop.permute.xlu1 %825 }
  0xec   : > { %v1276_v59 = vpop.eup %1275  ;;  %v634_v53 = vmul.f32 1.0614054, %v1274_v57 }
  0xed   : > { %v635_v63 = vmul.f32 1.0614054, %v1276_v59  ;;  %v1278_v21 = vpop.eup %1277 }
  0xee   : > { %v636_v0 = vadd.f32 -1.4531521, %v634_v53  ;;  %v1280_v30 = vpop.eup %1279 }
  0xef   : > { %v637_v3 = vadd.f32 -1.4531521, %v635_v63 }
  0xf0   : > { %v638_v11 = vmul.f32 %v1274_v57, %v636_v0 }
  0xf1   : > { %v639_v13 = vmul.f32 %v1276_v59, %v637_v3 }
  0xf2   : > { %v640_v14 = vadd.f32 1.4214138, %v638_v11 }
  0xf3   : > { %v641_v15 = vadd.f32 1.4214138, %v639_v13 }
  0xf4   : > { %v642_v17 = vmul.f32 %v1274_v57, %v640_v14 }
  0xf5   : > { %v643_v18 = vmul.f32 %v1276_v59, %v641_v15 }
  0xf6   : > { %v644_v20 = vadd.f32 -0.28449672, %v642_v17 }
  0xf7   : > { %v645_v22 = vadd.f32 -0.28449672, %v643_v18 }
  0xf8   : > { %v646_v42 = vmul.f32 %v1274_v57, %v644_v20 }
  0xf9   : > { %v647_v23 = vmul.f32 %v1276_v59, %v645_v22 }
  0xfa   : > { %v648_v24 = vadd.f32 0.2548296, %v646_v42 }
  0xfb   : > { %v649_v16 = vadd.f32 0.2548296, %v647_v23 }
  0xfc   : > { %v650_v19 = vmul.f32 %v1274_v57, %v648_v24  ;;  %v1725_v57 = vpop.permute.xlu0 %751 }
  0xfd   : > { %v651_v26 = vmul.f32 %v1276_v59, %v649_v16 }
  0xfe   : > { %v660_v4 = vmul.f32 %v1278_v21, %v650_v19 }
  0xff   : > { %v661_v33 = vmul.f32 %v1280_v30, %v651_v26 }
 0x100   : > { %v662_v34 = vsub.f32 1.0, %v660_v4  ;;  %v1727_v59 = vpop.permute.xlu0 %768 }
 0x101   : > { %v663_v37 = vsub.f32 1.0, %v661_v33 }
 0x102   : > { %v664_v39 = vmul.f32 %v662_v34, %v624_v36 }
 0x103   : > { %v665_v40 = vmul.f32 %v663_v37, %v625_v38 }
 0x104   : > { %v666_v43 = vadd.f32 1.0, %v664_v39  ;;  %v1729_v53 = vpop.permute.xlu0 %789 }
 0x105   : > { %v667_v44 = vadd.f32 1.0, %v665_v40 }
 0x106   : > { %v1682_v45 = vmul.f32 %v666_v43, %v618_v41 }
 0x107   : > { %v1686_v48 = vmul.f32 %v667_v44, %v619_v50 }
 0x108   : > { %695 = vrot.lane.b32.xlu0 %v1682_v45, %s1381_s27  ;;  %671 = vrot.lane.b32.xlu1 %v1682_v45, %s1382_s28  ;;  %v689_v62 = vpop.permute.xlu0 %688 }
 0x10c   : > { %760 = vrot.lane.b32.xlu0 %v1686_v48, %s1383_s29  ;;  %673 = vrot.lane.b32.xlu1 %v1686_v48, %s1382_s28 }
 0x110   : > { %775 = vrot.lane.b32.xlu0 %v1682_v45, %s1384_s30  ;;  %697 = vrot.lane.b32.xlu1 %v1686_v48, %s1381_s27 }
 0x114   : > { %796 = vrot.lane.b32.xlu0 %v1682_v45, %s1385_s12  ;;  %712 = vrot.lane.b32.xlu1 %v1682_v45, %s1386_s18 }
 0x118   : > { %813 = vrot.lane.b32.xlu0 %v1682_v45, %s1387_s20  ;;  %714 = vrot.lane.b32.xlu1 %v1686_v48, %s1386_s18 }
 0x11c   : > { %733 = vrot.lane.b32.xlu1 %v1682_v45, %s1388_s26  ;;  %835 = vperm.xlu0 %1261, %v832_v46  }
 0x120   : > { %735 = vrot.lane.b32.xlu1 %v1686_v48, %s1388_s26  ;;  %1266 = vset.pattern.permute.xlu0 %v1367_v6 }
 0x121   : > { %881 = vperm.xlu0 %1266, %v832_v46  }
 0x124   : > { %758 = vrot.lane.b32.xlu1 %v1682_v45, %s1383_s29 }
 0x125   : > { %1268 = vset.pattern.permute.xlu0 %v1372_v10 }
 0x126   : > { %967 = vperm.xlu0 %1268, %v964_v47  }
 0x128   : > { %777 = vrot.lane.b32.xlu1 %v1686_v48, %s1384_s30  ;;  %s1302_s30 = sshll.u32 %s1389_s17, 4  ;;  %s1303_s30 = int_to_ptr.vmem [resolvable:$false] %s1302_s30 }
 0x12a   : > { %1271 = vset.pattern.permute.xlu0 %v1367_v6  ;;  %v904_v6 = vld [vmem:[%s1898_s8] sm:$0xf] }
 0x12b   : > { %1013 = vperm.xlu0 %1271, %v964_v47  }
 0x12c   : > { %798 = vrot.lane.b32.xlu1 %v1686_v48, %s1385_s12  ;;  %s350_s12 = sand.u32 1, %s1352_s14  }
 0x12d   : > { %s1090_s29 = scalar_lea.sflag [#allocation3], %s350_s12 }
 0x130   : > { %849 = vperm.xlu1 %1264, %v832_v46  }
 0x134   : > { %815 = vrot.lane.b32.xlu1 %v1686_v48, %s1387_s20  ;;  %s1167_s20 = sshll.u32 %s350_s12, 3 }
 0x135   : > { %1265 = vset.pattern.permute.xlu1 %v1362_v1  ;;  %s352_s26 = scalar_lea.vmem [#allocation2], %s1167_s20  ;;  %s1304_s20 = scalar_lea.vmem %s1303_s30, 256 }
 0x136   : > { %s1104_s27 = sshll.u32 %s352_s26, 4  ;;  %s1850_s27 = int_to_ptr.vmem [resolvable:$true] %s1104_s27 }
 0x137   : > { %p1305_p0 = scmp.lt.s32.totalorder %s1850_s27, %s1303_s30 }
 0x138   : > { %865 = vperm.xlu1 %1265, %v832_v46  }
 0x13c   : > { %1267 = vset.pattern.permute.xlu1 %v1372_v10 }
 0x13d   : > { %899 = vperm.xlu1 %1267, %v896_v49  }
 0x141   : > { %907 = vperm.xlu1 %1267, %v904_v6  }
 0x145   : > { %1269 = vset.pattern.permute.xlu1 %v1363_v2 }
 0x146   : > { %981 = vperm.xlu1 %1269, %v964_v47  }
 0x14a   : > { %1270 = vset.pattern.permute.xlu1 %v1362_v1 }
 0x14b   : > { %997 = vperm.xlu1 %1270, %v964_v47  }
 0x17a   : > { %v672_v55 = vpop.permute.xlu1 %671  ;;  %v696_v0 = vpop.permute.xlu0 %695 }
 0x17e   : > { %v674_v10 = vpop.permute.xlu1 %673  ;;  %v761_v22 = vpop.permute.xlu0 %760 }
 0x17f   : > { %v677_v11 = vsel %vm675_vm7, %v674_v10, %v672_v55  ;;  %v676_v17 = vsel %vm675_vm7, %v672_v55, %v674_v10 }
 0x180   : > { %v684_v42 = vsel %vm1741_vm10, %v677_v11, 0.0  ;;  %v685_v21 = vsel %vm681_vm13, %v676_v17, 0.0 }
 0x181   : > { %v691_v4 = vmul.f32 %v689_v62, %v684_v42  ;;  %v692_v38 = vmul.f32 %v689_v62, %v685_v21 }
 0x182   : > { %v698_v31 = vpop.permute.xlu1 %697  ;;  %v776_v43 = vpop.permute.xlu0 %775 }
 0x183   : > { %v701_v3 = vsel %vm699_vm4, %v698_v31, %v696_v0  ;;  %v700_v23 = vsel %vm699_vm4, %v696_v0, %v698_v31  ;;  %v754_v31 = vmul.f32 %v1725_v57, %v1682_v45  ;;  %v755_v45 = vmul.f32 %v1725_v57, %v1686_v48 }
 0x184   : > { %v702_v14 = vsel %vm678_vm5, %v701_v3, 0.0  ;;  %v709_v33 = vmul.f32 %v706_v51, %v700_v23  ;;  %vm817_vm4 = vcmp.lt.s32.totalorder %v1556_v25, 77  ;;  %vm821_vm5 = vmand %vm783_vm1, %vm720_vm14 }
 0x185   : > { %v708_v16 = vmul.f32 %v706_v51, %v702_v14 }
 0x186   : > { %v713_v58 = vpop.permute.xlu1 %712  ;;  %v711_v44 = vadd.f32 %v709_v33, %v692_v38 }
 0x187   : > { %v710_v39 = vadd.f32 %v708_v16, %v691_v4 }
 0x18a   : > { %v715_v2 = vpop.permute.xlu1 %714 }
 0x18b   : > { %v718_v13 = vsel %vm716_vm8, %v715_v2, %v713_v58  ;;  %v717_v18 = vsel %vm716_vm8, %v713_v58, %v715_v2 }
 0x18c   : > { %v723_v24 = vsel %vm1748_vm12, %v718_v13, 0.0  ;;  %v724_v26 = vsel %vm720_vm14, %v717_v18, 0.0 }
 0x18d   : > { %v729_v34 = vmul.f32 %v727_v52, %v723_v24  ;;  %v730_v40 = vmul.f32 %v727_v52, %v724_v26 }
 0x18e   : > { %v734_v1 = vpop.permute.xlu1 %733 }
 0x18f   : > { %v731_v50 = vadd.f32 %v729_v34, %v710_v39  ;;  %v732_v49 = vadd.f32 %v730_v40, %v711_v44 }
 0x192   : > { %v736_v63 = vpop.permute.xlu1 %735 }
 0x193   : > { %v739_v20 = vsel %vm737_vm11, %v736_v63, %v734_v1  ;;  %v738_v19 = vsel %vm737_vm11, %v734_v1, %v736_v63  ;;  %v797_v1 = vpop.permute.xlu0 %796 }
 0x194   : > { %v740_v30 = vsel %vm680_vm6, %v739_v20, 0.0  ;;  %v741_v36 = vsel %vm681_vm13, %v738_v19, 0.0 }
 0x195   : > { %v746_v41 = vmul.f32 %v744_v56, %v740_v30  ;;  %v747_v46 = vmul.f32 %v744_v56, %v741_v36 }
 0x196   : > { %v759_v15 = vpop.permute.xlu1 %758 }
 0x197   : > { %v763_v47 = vsel %vm762_vm15, %v759_v15, %v761_v22  ;;  %v748_v6 = vadd.f32 %v746_v41, %v731_v50  ;;  %v764_v51 = vsel %vm762_vm15, %v761_v22, %v759_v15  ;;  %v749_v58 = vadd.f32 %v747_v46, %v732_v49  ;;  %v814_v23 = vpop.permute.xlu0 %813 }
 0x198   : > { %v765_v10 = vsel %vm719_vm9, %v763_v47, 0.0  ;;  %v766_v62 = vsel %vm720_vm14, %v764_v51, 0.0 }
 0x199   : > { %v756_v0 = vadd.f32 %v754_v31, %v748_v6  ;;  %v771_v3 = vmul.f32 %v1727_v59, %v765_v10  ;;  %v757_v12 = vadd.f32 %v755_v45, %v749_v58  ;;  %v772_v13 = vmul.f32 %v1727_v59, %v766_v62 }
 0x19a   : > { %v778_v37 = vpop.permute.xlu1 %777 }
 0x19b   : > { %v780_v55 = vsel %vm779_vm0, %v776_v43, %v778_v37  ;;  %v781_v2 = vsel %vm779_vm0, %v778_v37, %v776_v43  ;;  %v773_v17 = vadd.f32 %v771_v3, %v756_v0  ;;  %v774_v20 = vadd.f32 %v772_v13, %v757_v12  ;;  %v836_v34 = vpop.permute.xlu0 %835 }
 0x19c   : > { %v786_v63 = vsel %vm680_vm6, %v780_v55, 0.0  ;;  %v787_v11 = vsel %vm1786_vm3, %v781_v2, 0.0 }
 0x19d   : > { %v792_v14 = vmul.f32 %v1729_v53, %v786_v63  ;;  %v793_v18 = vmul.f32 %v1729_v53, %v787_v11 }
 0x19e   : > { %v799_v52 = vpop.permute.xlu1 %798 }
 0x19f   : > { %v802_v9 = vsel %vm800_vm2, %v799_v52, %v797_v1  ;;  %v801_v15 = vsel %vm800_vm2, %v797_v1, %v799_v52  ;;  %v794_v22 = vadd.f32 %v792_v14, %v773_v17  ;;  %v795_v16 = vadd.f32 %v793_v18, %v774_v20 }
 0x1a0   : > { %v804_v48 = vsel %vm783_vm1, %v802_v9, 0.0  ;;  %v809_v42 = vmul.f32 %v1721_v54, %v801_v15  ;;  %v882_v47 = vpop.permute.xlu0 %881 }
 0x1a1   : > { %v810_v59 = vmul.f32 %v1721_v54, %v804_v48 }
 0x1a2   : > { %v811_v26 = vadd.f32 %v809_v42, %v794_v22 }
 0x1a3   : > { %v812_v30 = vadd.f32 %v810_v59, %v795_v16 }
 0x1af   : > { %v850_v57 = vpop.permute.xlu1 %849 }
 0x1b3   : > { %v816_v24 = vpop.permute.xlu1 %815 }
 0x1b4   : > { %v818_v19 = vsel %vm817_vm4, %v814_v23, %v816_v24  ;;  %v819_v21 = vsel %vm817_vm4, %v816_v24, %v814_v23 }
 0x1b5   : > { %v822_v53 = vsel %vm719_vm9, %v818_v19, 0.0  ;;  %v823_v25 = vsel %vm821_vm5, %v819_v21, 0.0 }
 0x1b6   : > { %v828_v4 = vmul.f32 %v1723_v27, %v822_v53  ;;  %v829_v54 = vmul.f32 %v1723_v27, %v823_v25 }
 0x1b7   : > { %v866_v28 = vpop.permute.xlu1 %865 }
 0x1b8   : > { %v830_v33 = vadd.f32 %v828_v4, %v811_v26  ;;  %v831_v32 = vadd.f32 %v829_v54, %v812_v30 }
 0x1ba   : > { %v841_v36 = vrot.slane %v830_v33, %v1661_v60  ;;  %v845_v37 = vrot.slane %v831_v32, %v1661_v60  ;;  %v855_v38 = vrot.slane %v830_v33, %v1664_v61  ;;  %v859_v29 = vrot.slane %v831_v32, %v1664_v61 }
 0x1bb   : > { %v871_v39 = vrot.slane %v830_v33, %v1670_v8  ;;  %v875_v40 = vrot.slane %v831_v32, %v1670_v8  ;;  %v887_v41 = vrot.slane %v830_v33, %v1667_v5  ;;  %v891_v27 = vrot.slane %v831_v32, %v1667_v5 }
 0x1bc   : > { %v846_v43 = vmul.f32 %v841_v36, %v836_v34  ;;  %v847_v44 = vmul.f32 %v845_v37, %v836_v34  ;;  %v860_v50 = vmul.f32 %v855_v38, %v850_v57  ;;  %v861_v46 = vmul.f32 %v859_v29, %v850_v57  ;;  %v900_v10 = vpop.permute.xlu1 %899 }
 0x1bd   : > { %v876_v51 = vmul.f32 %v871_v39, %v866_v28  ;;  %v877_v55 = vmul.f32 %v875_v40, %v866_v28  ;;  %v892_v58 = vmul.f32 %v887_v41, %v882_v47  ;;  %v893_v56 = vmul.f32 %v891_v27, %v882_v47 }
 0x1be   : > { %v862_v49 = vadd.f32 %v860_v50, %v846_v43  ;;  %v863_v6 = vadd.f32 %v861_v46, %v847_v44 }
 0x1c0   : > { %v878_v52 = vadd.f32 %v876_v51, %v862_v49  ;;  %v879_v31 = vadd.f32 %v877_v55, %v863_v6  ;;  %v908_v45 = vpop.permute.xlu1 %907 }
 0x1c2   : > { %v894_v2 = vadd.f32 %v892_v58, %v878_v52  ;;  %v895_v1 = vadd.f32 %v893_v56, %v879_v31  ;;  %v968_v58 = vpop.permute.xlu0 %967 }
 0x1c4   : > { %v902_v62 = vmul.f32 %v900_v10, %v894_v2  ;;  %v903_v63 = vmul.f32 %v900_v10, %v895_v1 }
 0x1c5   : > { %v982_v51 = vpop.permute.xlu1 %981 }
 0x1c6   : > { %v910_v0 = vadd.f32 %v908_v45, %v902_v62  ;;  %v911_v3 = vadd.f32 %v908_v45, %v903_v63 }
 0x1c8   : > { %v914_v9 = vmul.f32 0.70710677, %v910_v0  ;;  %v915_v11 = vmul.f32 0.70710677, %v911_v3  ;;  %v912_v55 = vmul.f32 0.5, %v910_v0  ;;  %v913_v52 = vmul.f32 0.5, %v911_v3 }
 0x1ca   : > { %v920_v12 = vand.u32 2147483647, %v914_v9  ;;  %v921_v13 = vand.u32 2147483647, %v915_v11  ;;  %vm916_vm6 = vcmp.ge.f32.partialorder %v914_v9, 0.0  ;;  %vm917_vm7 = vcmp.ge.f32.partialorder %v915_v11, 0.0 }
 0x1cb   : > { %v918_v50 = vsel %vm916_vm6, 1.0, %v1380_v35  ;;  %v919_v47 = vsel %vm917_vm7, 1.0, %v1380_v35 }
 0x1cc   : > { %v922_v14 = vmul.f32 0.3275911, %v920_v12  ;;  %v923_v15 = vmul.f32 0.3275911, %v921_v13  ;;  %v946_v17 = vsub.f32 0.0, %v920_v12  ;;  %v947_v18 = vsub.f32 0.0, %v921_v13 }
 0x1ce   : > { %v924_v48 = vadd.f32 1.0, %v922_v14  ;;  %v925_v57 = vadd.f32 1.0, %v923_v15  ;;  %v948_v22 = vmul.f32 %v946_v17, %v920_v12  ;;  %v949_v23 = vmul.f32 %v947_v18, %v921_v13  ;;  %v998_v12 = vpop.permute.xlu1 %997 }
 0x1d0   : > { %1281 = vrcp.f32 %v924_v48  ;;  %v950_v21 = vmul.f32 1.442695, %v948_v22  ;;  %v952_v25 = vmul.f32 1.442695, %v949_v23  ;;  %v1014_v48 = vpop.permute.xlu0 %1013 }
 0x1d1   : > { %1283 = vrcp.f32 %v925_v57 }
 0x1d2   : > { %1285 = vpow2.f32 %v950_v21 }
 0x1d3   : > { %1287 = vpow2.f32 %v952_v25 }
 0x1da   : > { %v1282_v20 = vpop.eup %1281 }
 0x1db   : > { %v1284_v42 = vpop.eup %1283  ;;  %v928_v59 = vmul.f32 1.0614054, %v1282_v20 }
 0x1dc   : > { %v929_v24 = vmul.f32 1.0614054, %v1284_v42  ;;  %v1286_v39 = vpop.eup %1285 }
 0x1dd   : > { %v930_v16 = vadd.f32 -1.4531521, %v928_v59  ;;  %v1288_v41 = vpop.eup %1287 }
 0x1de   : > { %v931_v19 = vadd.f32 -1.4531521, %v929_v24 }
 0x1df   : > { %v932_v53 = vmul.f32 %v1282_v20, %v930_v16 }
 0x1e0   : > { %v933_v26 = vmul.f32 %v1284_v42, %v931_v19 }
 0x1e1   : > { %v934_v30 = vadd.f32 1.4214138, %v932_v53 }
 0x1e2   : > { %v935_v4 = vadd.f32 1.4214138, %v933_v26 }
 0x1e3   : > { %v936_v54 = vmul.f32 %v1282_v20, %v934_v30 }
 0x1e4   : > { %v937_v33 = vmul.f32 %v1284_v42, %v935_v4 }
 0x1e5   : > { %v938_v32 = vadd.f32 -0.28449672, %v936_v54 }
 0x1e6   : > { %v939_v34 = vadd.f32 -0.28449672, %v937_v33 }
 0x1e7   : > { %v940_v28 = vmul.f32 %v1282_v20, %v938_v32 }
 0x1e8   : > { %v941_v36 = vmul.f32 %v1284_v42, %v939_v34 }
 0x1e9   : > { %v942_v37 = vadd.f32 0.2548296, %v940_v28 }
 0x1ea   : > { %v943_v38 = vadd.f32 0.2548296, %v941_v36 }
 0x1eb   : > { %v944_v29 = vmul.f32 %v1282_v20, %v942_v37 }
 0x1ec   : > { %v945_v40 = vmul.f32 %v1284_v42, %v943_v38 }
 0x1ed   : > { %v954_v27 = vmul.f32 %v1286_v39, %v944_v29 }
 0x1ee   : > { %v955_v43 = vmul.f32 %v1288_v41, %v945_v40 }
 0x1ef   : > { %v956_v44 = vsub.f32 1.0, %v954_v27 }
 0x1f0   : > { %v957_v46 = vsub.f32 1.0, %v955_v43 }
 0x1f1   : > { %v958_v49 = vmul.f32 %v956_v44, %v918_v50 }
 0x1f2   : > { %v959_v6 = vmul.f32 %v957_v46, %v919_v47 }
 0x1f3   : > { %v960_v10 = vadd.f32 1.0, %v958_v49 }
 0x1f4   : > { %v961_v31 = vadd.f32 1.0, %v959_v6 }
 0x1f5   : > { %v962_v56 = vmul.f32 %v960_v10, %v912_v55 }
 0x1f6   : > { %v963_v2 = vmul.f32 %v961_v31, %v913_v52 }
 0x1f7   : > { %v973_v1 = vrot.slane %v962_v56, %v1661_v60  ;;  %v987_v62 = vrot.slane %v962_v56, %v1664_v61  ;;  %v1003_v63 = vrot.slane %v962_v56, %v1670_v8  ;;  %v1019_v3 = vrot.slane %v962_v56, %v1667_v5 }
 0x1f8   : > { %v977_v45 = vrot.slane %v963_v2, %v1661_v60  ;;  %v991_v9 = vrot.slane %v963_v2, %v1664_v61  ;;  %v1007_v11 = vrot.slane %v963_v2, %v1670_v8  ;;  %v1023_v57 = vrot.slane %v963_v2, %v1667_v5 }
 0x1f9   : > { %v978_v0 = vmul.f32 %v973_v1, %v968_v58  ;;  %v992_v13 = vmul.f32 %v987_v62, %v982_v51  ;;  %v1008_v18 = vmul.f32 %v1003_v63, %v998_v12  ;;  %v1024_v42 = vmul.f32 %v1019_v3, %v1014_v48 }
 0x1fa   : > { %v979_v14 = vmul.f32 %v977_v45, %v968_v58  ;;  %v993_v15 = vmul.f32 %v991_v9, %v982_v51  ;;  %v1009_v22 = vmul.f32 %v1007_v11, %v998_v12  ;;  %v1025_v59 = vmul.f32 %v1023_v57, %v1014_v48 }
 0x1fb   : > { %v994_v17 = vadd.f32 %v992_v13, %v978_v0 }
 0x1fc   : > { %v995_v20 = vadd.f32 %v993_v15, %v979_v14 }
 0x1fd   : > { %v1010_v60 = vadd.f32 %v1008_v18, %v994_v17  ;;  %v1297_v17 = vld [vmem:[%s1503_s11] sm:$0xff]  ;;  %s1298_s11 = scalar_lea.vmem %s1850_s27, 128 }
 0x1fe   : > { %v1011_v61 = vadd.f32 %v1009_v22, %v995_v20  ;;  %p1299_p11 = scmp.ne.s32.totalorder %s1850_s27, %s1298_s11  ;;  %p1306_p1 = scmp.lt.s32.totalorder %s1304_s20, %s1298_s11 }
 0x1ff   : > { %v1026_v23 = vadd.f32 %v1024_v42, %v1010_v60 }
 0x200   : > { %v1027_v8 = vadd.f32 %v1025_v59, %v1011_v61  ;;  %p1300_p12 = pnand %p1299_p11, %p1483_p5  ;;  %p1307_p2 = por %p1306_p1, %p1305_p0 }
 0x201   : > { %v1028_v24 = vmax.f32 %v1026_v23, 0.0 }
 0x202   : > { %v1029_v16 = vmax.f32 %v1027_v8, 0.0  ;;  %p1301_p13 = pneg %p1300_p12 }
 0x203   : > { %v1032_v19 = vmul.f32 0.70710677, %v1028_v24  ;;  %v1030_v13 = vmul.f32 0.5, %v1028_v24 }
 0x204   : > { %v1033_v21 = vmul.f32 0.70710677, %v1029_v16  ;;  %v1031_v14 = vmul.f32 0.5, %v1029_v16  ;;  %p1308_p3 = pnand %p1307_p2, %p1301_p13 }
 0x205   : > { %v1038_v53 = vand.u32 2147483647, %v1032_v19  ;;  %vm1034_vm8 = vcmp.ge.f32.partialorder %v1032_v19, 0.0 }
 0x206   : > { %v1039_v25 = vand.u32 2147483647, %v1033_v21  ;;  %vm1035_vm9 = vcmp.ge.f32.partialorder %v1033_v21, 0.0  ;;  %v1036_v45 = vsel %vm1034_vm8, 1.0, %v1380_v35 }
 0x207   : > { %v1040_v26 = vmul.f32 0.3275911, %v1038_v53  ;;  %v1064_v54 = vsub.f32 0.0, %v1038_v53  ;;  %v1037_v11 = vsel %vm1035_vm9, 1.0, %v1380_v35 }
 0x208   : > { %v1041_v30 = vmul.f32 0.3275911, %v1039_v25  ;;  %v1065_v33 = vsub.f32 0.0, %v1039_v25 }
 0x209   : > { %v1042_v4 = vadd.f32 1.0, %v1040_v26  ;;  %v1066_v34 = vmul.f32 %v1064_v54, %v1038_v53 }
 0x20a   : > { %v1043_v5 = vadd.f32 1.0, %v1041_v30  ;;  %v1067_v37 = vmul.f32 %v1065_v33, %v1039_v25 }
 0x20b   : > { %1289 = vrcp.f32 %v1042_v4  ;;  %v1068_v40 = vmul.f32 1.442695, %v1066_v34 }
 0x20c   : > { %1291 = vrcp.f32 %v1043_v5  ;;  %v1070_v27 = vmul.f32 1.442695, %v1067_v37 }
 0x20d   : > { %1293 = vpow2.f32 %v1068_v40 }
 0x20e   : > { %1295 = vpow2.f32 %v1070_v27 }
 0x215   : > { %v1290_v32 = vpop.eup %1289 }
 0x216   : > { %v1292_v28 = vpop.eup %1291  ;;  %v1046_v36 = vmul.f32 1.0614054, %v1290_v32 }
 0x217   : > { %v1047_v38 = vmul.f32 1.0614054, %v1292_v28  ;;  %v1294_v58 = vpop.eup %1293 }
 0x218   : > { %v1048_v29 = vadd.f32 -1.4531521, %v1046_v36  ;;  %v1296_v2 = vpop.eup %1295 }
 0x219   : > { %v1049_v39 = vadd.f32 -1.4531521, %v1047_v38 }
 0x21a   : > { %v1050_v41 = vmul.f32 %v1290_v32, %v1048_v29 }
 0x21b   : > { %v1051_v43 = vmul.f32 %v1292_v28, %v1049_v39 }
 0x21c   : > { %v1052_v44 = vadd.f32 1.4214138, %v1050_v41 }
 0x21d   : > { %v1053_v50 = vadd.f32 1.4214138, %v1051_v43 }
 0x21e   : > { %v1054_v46 = vmul.f32 %v1290_v32, %v1052_v44 }
 0x21f   : > { %v1055_v47 = vmul.f32 %v1292_v28, %v1053_v50 }
 0x220   : > { %v1056_v49 = vadd.f32 -0.28449672, %v1054_v46 }
 0x221   : > { %v1057_v6 = vadd.f32 -0.28449672, %v1055_v47 }
 0x222   : > { %v1058_v51 = vmul.f32 %v1290_v32, %v1056_v49 }
 0x223   : > { %v1059_v55 = vmul.f32 %v1292_v28, %v1057_v6 }
 0x224   : > { %v1060_v10 = vadd.f32 0.2548296, %v1058_v51 }
 0x225   : > { %v1061_v52 = vadd.f32 0.2548296, %v1059_v55 }
 0x226   : > { %v1062_v31 = vmul.f32 %v1290_v32, %v1060_v10 }
 0x227   : > { %v1063_v56 = vmul.f32 %v1292_v28, %v1061_v52 }
 0x228   : > { %v1072_v1 = vmul.f32 %v1294_v58, %v1062_v31 }
 0x229   : > { %v1073_v62 = vmul.f32 %v1296_v2, %v1063_v56 }
 0x22a   : > { %v1074_v63 = vsub.f32 1.0, %v1072_v1 }
 0x22b   : > { %v1075_v9 = vsub.f32 1.0, %v1073_v62 }
 0x22c   : > { %v1076_v12 = vmul.f32 %v1074_v63, %v1036_v45 }
 0x22d   : > { %v1077_v0 = vmul.f32 %v1075_v9, %v1037_v11 }
 0x22e   : > { %v1078_v3 = vadd.f32 1.0, %v1076_v12 }
 0x22f   : > { %v1079_v15 = vadd.f32 1.0, %v1077_v0 }
 0x230   : > { %v1080_v48 = vmul.f32 %v1078_v3, %v1030_v13 }
 0x231   : > { %v1081_v57 = vmul.f32 %v1079_v15, %v1031_v14 }
 0x232   : > { %v1082_v18 = vmul.f32 %v1297_v17, %v1080_v48 }
 0x233   : > { %v1083_v20 = vmul.f32 %v1081_v57, %v1513_v7 }
 0x235   : > { %v1086_v22 = vcombine.low %v1082_v18, %v1083_v20 }
 0x237   : > { %1088 = vst [vmem:[%s352_s26] sm:$0xff] %v1086_v22 }
 0x238   : > { %1311 = shalt.err (!%p1308_p3)
}
 0x239   : > { %s1312_s12 = scalar_lea.hbm %s1848_s21, 128  ;;  %s1316_s28 = scalar_lea.hbm %s1900_s10, 256 }
 0x23a   : > { %p1313_p4 = scmp.ne.s32.totalorder %s1848_s21, %s1312_s12  ;;  %p1317_p9 = scmp.lt.u32.totalorder %s1848_s21, %s1900_s10 }
 0x23b   : > { %p1318_p10 = scmp.lt.u32.totalorder %s1316_s28, %s1312_s12  ;;  %p1320_p12 = scmp.lt.u32.totalorder %s1312_s12, %s1848_s21 }
 0x23c   : > { %p1314_p7 = pnand %p1313_p4, %p1483_p5 }
 0x23d   : > { %p1319_p11 = por %p1318_p10, %p1317_p9 }
 0x23e   : > { %p1315_p8 = pneg %p1314_p7 }
 0x23f   : > { %p1321_p13 = por %p1320_p12, %p1319_p11 }
 0x241   : > { %p1322_p0 = pnand %p1321_p13, %p1315_p8 }
 0x243   : > { %1325 = shalt.err (!%p1322_p0)
}
 0x244   : > { %1177 = dma.vmem_to_hbm [thread:$0]  (%p1483_p5), %s1850_s27, 128, %s1848_s21, %s1090_s29  }
 0x245 PF: > { %p1183_p1 = scmp.ge.s32.totalorder %s1360_s16, 2  ;;  %s1116_s11 = sand.u32 1, %s1348_s13  }
 0x246   : > { %s1117_s30 = scalar_lea.sflag [#allocation3], %s1116_s11 }
 0x247   : > { %p1180_p2 = pnand %p1183_p1, %p1487_p6 }
 0x249   : > { %1343 = dma.done.wait (!%p1180_p2), %s1117_s30, 128  }
 0x24a   : > { %1345 = vsyncadd (!%p1180_p2), %s1117_s30, 4294967168  ;;  %p20_p3 = scmp.ge.s32.totalorder %s1470_s19, 4   ;;  %s1915_s13 = smov %s1352_s14 }
 0x24b   : > { %s1916_s14 = smov %s1356_s15  ;;  %s1917_s15 = smov %s1481_s22 }
 0x24c   : > { %s1918_s16 = smov %s1470_s19  ;;  %22 = sbr.rel (!%p20_p3) target bundleno = 3 (0x3), region = 95 }
 0x253   :  { %1122 = vsyncpa [#allocation3], 1 }
 0x254   :  { %1124 = vsyncpa [#allocation3 + $0x1], 1 }

</bundles_post_ra>
